<compile_context>
chip_gen: v7x
topology: tpu7x:2x2x1
jax: 0.10.0
libtpu: 0.0.40
codegen_flags: <defaults>
</compile_context>

<pallas_src>
import functools

import jax
import jax.numpy as jnp
from jax import lax
from jax.experimental import pallas as pl
from jax.experimental.pallas import tpu as pltpu


# ---------------------------------------------------------------------------
# Per-generation VMEM budget (fraction of physical, capped).
# ---------------------------------------------------------------------------
@functools.lru_cache(maxsize=None)
def _vmem_capacity_bytes():
    try:
        return int(pltpu.get_tpu_info().vmem_capacity_bytes)
    except Exception:            # pragma: no cover - conservative fallback (fits v7x)
        return 64 * 1024 * 1024


def _vmem_limit(frac):
    return int(min(frac * _vmem_capacity_bytes(), 112 * 1024 * 1024))


# ---------------------------------------------------------------------------
# Conv branch kernel: one grid step per batch element, channel-last layout.
# ---------------------------------------------------------------------------
def _conv_branch_kernel(use_bn, x_ref, w1_ref, b1_ref, w2f_ref, b2_ref,
                        s1_ref, t1_ref, s2_ref, t2_ref,
                        o_ref, c1_buf, c2_buf):
    H = w1_ref.shape[-1]
    L1 = c1_buf.shape[0]          # L - 2      (after conv1)
    L2 = c2_buf.shape[0]          # P1 - 2     (after conv2)
    P1 = L1 // 2
    P2 = o_ref.shape[1]           # L2 // 2

    xcol = x_ref[0]               # (L, 1) f32

    # conv1 (in_channels=1, k=3): three VPU broadcast multiply-adds (cross-correlation).
    out1 = (xcol[0:L1] * w1_ref[0:1, :]
            + xcol[1:L1 + 1] * w1_ref[1:2, :]
            + xcol[2:L1 + 2] * w1_ref[2:3, :]
            + b1_ref[...])                                   # (L1, H) f32
    if use_bn:   # eval-mode BatchNorm folded to per-channel scale/shift, then ReLU
        out1 = jnp.maximum(out1 * s1_ref[...] + t1_ref[...], 0.0)
    c1_buf[...] = out1

    # AvgPool1d(2): strided pairwise mean on the VPU (no dense pooling matmul).
    p1 = 0.5 * (c1_buf[pl.ds(0, P1, stride=2), :] +
                c1_buf[pl.ds(1, P1, stride=2), :])           # (P1, H) f32

    # conv2 (H -> H, k=3) as three accumulating (L2,H)x(H,H) bf16 MXU matmuls
    # (no (L2, 3H) concat temporary), f32 accumulation.
    out2 = jnp.dot(p1[0:L2].astype(jnp.bfloat16), w2f_ref[0],
                   preferred_element_type=jnp.float32)
    for k in (1, 2):
        out2 = out2 + jnp.dot(p1[k:k + L2].astype(jnp.bfloat16), w2f_ref[k],
                              preferred_element_type=jnp.float32)
    out2 = out2 + b2_ref[...]                                # (L2, H) f32
    if use_bn:
        out2 = jnp.maximum(out2 * s2_ref[...] + t2_ref[...], 0.0)
    c2_buf[...] = out2

    p2 = 0.5 * (c2_buf[pl.ds(0, P2, stride=2), :] +
                c2_buf[pl.ds(1, P2, stride=2), :])           # (P2, H)
    o_ref[0] = jnp.tanh(p2).astype(o_ref.dtype)              # bf16 features for the GRU


def conv_branch(x_bl, params, use_bn):
    """x_bl: (B, L) float32 -> (B, P2, H) channel-last bf16 features."""
    B, L = x_bl.shape
    H = params["w1"].shape[-1]
    L1 = L - 2
    P1 = L1 // 2
    L2 = P1 - 2
    P2 = L2 // 2
    w2f = params["w2"].astype(jnp.bfloat16)          # (3, H, H) bf16 MXU operand

    def full(shape):
        return pl.BlockSpec(shape, lambda b: (0,) * len(shape))

    kernel = functools.partial(_conv_branch_kernel, use_bn)
    return pl.pallas_call(
        kernel,
        out_shape=jax.ShapeDtypeStruct((B, P2, H), jnp.bfloat16),
        grid=(B,),
        in_specs=[
            pl.BlockSpec((1, L, 1), lambda b: (b, 0, 0)),
            full((3, H)), full((1, H)), full((3, H, H)), full((1, H)),
            full((1, H)), full((1, H)), full((1, H)), full((1, H)),
        ],
        out_specs=pl.BlockSpec((1, P2, H), lambda b: (b, 0, 0)),
        scratch_shapes=[pltpu.VMEM((L1, H), jnp.float32),
                        pltpu.VMEM((L2, H), jnp.float32)],
        compiler_params=pltpu.CompilerParams(
            dimension_semantics=("parallel",),
            vmem_limit_bytes=_vmem_limit(0.5)),
    )(x_bl[:, :, None], params["w1"], params["b1"], w2f, params["b2"],
      params["s1"], params["t1"], params["s2"], params["t2"])


# ---------------------------------------------------------------------------
# Bidirectional GRU, one direction per grid step ("parallel" -> one per TC on v7x).
# Fused gate layout: columns ordered [r | z | n]
#   (== torch weight_ih_l0 / weight_hh_l0 transposed to (in, 3*hid)).
# Only the final hidden state of each direction is produced.
# ---------------------------------------------------------------------------
def _gru_dir_kernel(ag_ref, mhc_ref, wih_ref, whh_ref, bih_ref, bhh_ref,
                    hn_ref, gx_ref):
    B, T, Hc = ag_ref.shape
    D = whh_ref.shape[1]          # GRU hidden size == 2 * Hc
    d = pl.program_id(0)          # 0: forward, 1: backward (weights arrive per-direction)

    # ---- Hoisted input projection, batch-major: per batch row, (T,Hc)x(Hc,3D) dots.
    # x_t = cat([ag_t, mhc_t], channel)  =>  x @ W_ih == ag @ W_ih[:Hc] + mhc @ W_ih[Hc:]
    # (channel order matches torch.cat([ag, mhc], dim=1)).
    for b in range(B):            # static unroll; B is small
        gx = (jnp.dot(ag_ref[b], wih_ref[0, 0:Hc, :],
                      preferred_element_type=jnp.float32)
              + jnp.dot(mhc_ref[b], wih_ref[0, Hc:2 * Hc, :],
                        preferred_element_type=jnp.float32)
              + bih_ref[0])                                  # (T, 3D) f32
        gx_ref[b] = gx

    def read_gx(t):               # gather the (B, 3D) row-slab for timestep t
        rows = [gx_ref[b, pl.ds(t, 1), :] for b in range(B)]
        return jnp.concatenate(rows, axis=0)                 # (B, 3D) f32

    def step(i, h):
        # forward direction scans t = 0..T-1, backward scans t = T-1..0
        t = jnp.where(d == 0, i, T - 1 - i)
        gx = read_gx(t)
        gh = jnp.dot(h.astype(jnp.bfloat16), whh_ref[0],
                     preferred_element_type=jnp.float32) + bhh_ref[0]   # (B, 3D)
        r = jax.nn.sigmoid(gx[:, 0:D] + gh[:, 0:D])
        z = jax.nn.sigmoid(gx[:, D:2 * D] + gh[:, D:2 * D])
        n = jnp.tanh(gx[:, 2 * D:] + r * gh[:, 2 * D:])      # b_hn inside r*(...), as torch
        return (1.0 - z) * n + z * h

    h0 = jnp.zeros((B, D), jnp.float32)
    hn_ref[0] = lax.fori_loop(0, T, step, h0)


def gru_directions(ag_feat, mhc_feat, gru_p):
    """ag/mhc features: (B, T, Hc) bf16 -> final hidden states (2, B, D) f32."""
    B, T, Hc = ag_feat.shape
    D = gru_p["whh"].shape[-2]
    G = 3 * D
    wih = gru_p["wih"].astype(jnp.bfloat16)
    whh = gru_p["whh"].astype(jnp.bfloat16)

    def full3(shape):
        return pl.BlockSpec(shape, lambda d: (0, 0, 0))

    def per_dir(shape):
        return pl.BlockSpec(shape, lambda d: (d, 0, 0))

    return pl.pallas_call(
        _gru_dir_kernel,
        out_shape=jax.ShapeDtypeStruct((2, B, D), jnp.float32),
        grid=(2,),
        in_specs=[full3((B, T, Hc)), full3((B, T, Hc)),
                  per_dir((1, 2 * Hc, G)), per_dir((1, D, G)),
                  per_dir((1, 1, G)), per_dir((1, 1, G))],
        out_specs=per_dir((1, B, D)),
        scratch_shapes=[pltpu.VMEM((B, T, G), jnp.float32)],   # batch-major gx
        compiler_params=pltpu.CompilerParams(
            dimension_semantics=("parallel",),
            vmem_limit_bytes=_vmem_limit(0.85)),
    )(ag_feat, mhc_feat, wih, whh, gru_p["bih"], gru_p["bhh"])


# ---------------------------------------------------------------------------
# FFN head: Linear(2D, D) -> ReLU -> Dropout(eval: identity) -> Linear(D, 1)
# ---------------------------------------------------------------------------
def _ffn_kernel(hn_ref, w1_ref, b1_ref, w2_ref, b2_ref, o_ref):
    D = hn_ref.shape[-1]
    h_f = hn_ref[0].astype(jnp.bfloat16)      # (B, D) forward final state
    h_b = hn_ref[1].astype(jnp.bfloat16)      # (B, D) backward final state
    # last_hidden = [h_f | h_b]; split Linear1's rows instead of concatenating.
    hdn = (jnp.dot(h_f, w1_ref[0:D, :], preferred_element_type=jnp.float32)
           + jnp.dot(h_b, w1_ref[D:2 * D, :], preferred_element_type=jnp.float32)
           + b1_ref[...])
    hdn = jnp.maximum(hdn, 0.0)               # ReLU; Dropout(0.2) is identity in eval
    o_ref[...] = (jnp.dot(hdn.astype(jnp.bfloat16), w2_ref[...],
                          preferred_element_type=jnp.float32) + b2_ref[...])


def ffn_head(hn, ffn_p):
    B = hn.shape[1]
    vmem = pl.BlockSpec(memory_space=pltpu.MemorySpace.VMEM)
    return pl.pallas_call(
        _ffn_kernel,
        out_shape=jax.ShapeDtypeStruct((B, 1), jnp.float32),
        in_specs=[vmem] * 5,
        out_specs=vmem,
        compiler_params=pltpu.CompilerParams(vmem_limit_bytes=_vmem_limit(0.25)),
    )(hn, ffn_p["w1"].astype(jnp.bfloat16), ffn_p["b1"],
      ffn_p["w2"].astype(jnp.bfloat16), ffn_p["b2"])


# ---------------------------------------------------------------------------
# Full model forward
# ---------------------------------------------------------------------------
@jax.jit
def mhc_model_forward(mhc, antigen, params):
    mhc_feat = conv_branch(mhc, params["mhc"], use_bn=True)       # (B, T, H) bf16
    ag_feat = conv_branch(antigen, params["ag"], use_bn=False)    # (B, T, H) bf16
    hn = gru_directions(ag_feat, mhc_feat, params["gru"])         # (2, B, 2H) f32
    out = ffn_head(hn, params["ffn"])                             # (B, 1)
    return out[:, 0]                                              # .squeeze(-1)


# ---------------------------------------------------------------------------
# Deterministic parameter initialization (synthetic; shapes follow the module).
# To load real torch weights: conv w1[k,o]=c1.weight[o,0,k]; w2[k,c,o]=c2.weight[o,c,k];
# GRU wih[d]=weight_ih_l0(_reverse).T (gate order r,z,n preserved along columns),
# whh[d]=weight_hh_l0(_reverse).T, biases likewise; FFN weights transposed to (in, out).
# ---------------------------------------------------------------------------
def init_params(key, L, H):
    keys = iter(jax.random.split(key, 48))

    def nrm(shape, scale=0.1):
        return (scale * jax.random.normal(next(keys), shape)).astype(jnp.float32)

    def conv_branch_params(use_bn):
        p = {
            "w1": nrm((3, H)),
            "b1": nrm((1, H)),
            "w2": nrm((3, H, H), 0.05),
            "b2": nrm((1, H)),
        }
        if use_bn:
            eps = 1e-5
            for i in ("1", "2"):
                gamma = 1.0 + nrm((1, H))
                beta = nrm((1, H))
                mean = nrm((1, H))
                var = 1.0 + 0.1 * jnp.abs(jax.random.normal(next(keys), (1, H)))
                s = gamma / jnp.sqrt(var + eps)      # eval-mode BN folded to scale/shift
                p["s" + i] = s.astype(jnp.float32)
                p["t" + i] = (beta - mean * s).astype(jnp.float32)
        else:
            for i in ("1", "2"):
                p["s" + i] = jnp.ones((1, H), jnp.float32)
                p["t" + i] = jnp.zeros((1, H), jnp.float32)
        return p

    D = 2 * H   # model doubles hidden_size; GRU input == hidden == 2H
    return {
        "mhc": conv_branch_params(True),
        "ag": conv_branch_params(False),
        "gru": {                                  # fused [r|z|n] along last axis
            "wih": nrm((2, D, 3 * D)),
            "whh": nrm((2, D, 3 * D)),
            "bih": nrm((2, 1, 3 * D)),
            "bhh": nrm((2, 1, 3 * D)),
        },
        "ffn": {
            "w1": nrm((2 * D, D)),
            "b1": nrm((1, D)),
            "w2": nrm((D, 1)),
            "b2": nrm((1, 1)),
        },
    }


if __name__ == "__main__":
    B, L, H = 2, 32, 32   # batch, input_size (unirep dim), embed_size (512 in real model)
    key = jax.random.PRNGKey(0)
    kp, kx = jax.random.split(key)
    params = init_params(kp, L, H)
    k1, k2 = jax.random.split(kx)
    mhc = jax.random.normal(k1, (B, L), jnp.float32)
    antigen = jax.random.normal(k2, (B, L), jnp.float32)

    out = jax.block_until_ready(mhc_model_forward(mhc, antigen, params))
    assert out.shape == (B,), out.shape
    assert bool(jnp.all(jnp.isfinite(out)))
    print("KERNEL_OK")
</pallas_src>

<mosaic_0001>
module attributes {stable_mosaic.version = 11 : i64} {
  func.func @_conv_branch_kernel(%arg0: i32, %arg1: memref<1x32x1xf32, #tpu.memory_space<vmem>>, %arg2: memref<3x32xf32, #tpu.memory_space<vmem>>, %arg3: memref<1x32xf32, #tpu.memory_space<vmem>>, %arg4: memref<3x32x32xbf16, #tpu.memory_space<vmem>>, %arg5: memref<1x32xf32, #tpu.memory_space<vmem>>, %arg6: memref<1x32xf32, #tpu.memory_space<vmem>>, %arg7: memref<1x32xf32, #tpu.memory_space<vmem>>, %arg8: memref<1x32xf32, #tpu.memory_space<vmem>>, %arg9: memref<1x32xf32, #tpu.memory_space<vmem>>, %arg10: memref<1x6x32xbf16, #tpu.memory_space<vmem>>, %arg11: memref<30x32xf32, #tpu.memory_space<vmem>>, %arg12: memref<13x32xf32, #tpu.memory_space<vmem>>) attributes {dimension_semantics = [#tpu.dimension_semantics<parallel>], iteration_bounds = array<i64: 2>, scalar_prefetch = 0 : i64, scratch_operands = 2 : i64, tpu.core_type = #tpu.core_type<tc>, window_params = [{transform_indices = @transform_0, window_bounds = array<i64: 1, 32, 1>}, {pipeline_mode = #tpu.pipeline_mode<synchronous>, transform_indices = @transform_1, window_bounds = array<i64: 3, 32>}, {pipeline_mode = #tpu.pipeline_mode<synchronous>, transform_indices = @transform_2, window_bounds = array<i64: 1, 32>}, {pipeline_mode = #tpu.pipeline_mode<synchronous>, transform_indices = @transform_3, window_bounds = array<i64: 3, 32, 32>}, {pipeline_mode = #tpu.pipeline_mode<synchronous>, transform_indices = @transform_4, window_bounds = array<i64: 1, 32>}, {pipeline_mode = #tpu.pipeline_mode<synchronous>, transform_indices = @transform_5, window_bounds = array<i64: 1, 32>}, {pipeline_mode = #tpu.pipeline_mode<synchronous>, transform_indices = @transform_6, window_bounds = array<i64: 1, 32>}, {pipeline_mode = #tpu.pipeline_mode<synchronous>, transform_indices = @transform_7, window_bounds = array<i64: 1, 32>}, {pipeline_mode = #tpu.pipeline_mode<synchronous>, transform_indices = @transform_8, window_bounds = array<i64: 1, 32>}, {transform_indices = @transform_9, window_bounds = array<i64: 1, 6, 32>}]} {
    %c0 = arith.constant 0 : index
    %c0_0 = arith.constant 0 : index
    %c0_1 = arith.constant 0 : index
    %0 = vector.load %arg1[%c0, %c0_0, %c0_1] : memref<1x32x1xf32, #tpu.memory_space<vmem>>, vector<1x32x1xf32>
    %1 = vector.shape_cast %0 : vector<1x32x1xf32> to vector<32x1xf32>
    %2 = vector.extract_strided_slice %1 {offsets = [0, 0], sizes = [30, 1], strides = [1, 1]} : vector<32x1xf32> to vector<30x1xf32>
    %c0_2 = arith.constant 0 : index
    %c0_3 = arith.constant 0 : index
    %3 = vector.load %arg2[%c0_2, %c0_3] : memref<3x32xf32, #tpu.memory_space<vmem>>, vector<1x32xf32>
    %4 = vector.broadcast %2 : vector<30x1xf32> to vector<30x32xf32>
    %5 = vector.broadcast %3 : vector<1x32xf32> to vector<30x32xf32>
    %6 = arith.mulf %4, %5 : vector<30x32xf32>
    %7 = vector.extract_strided_slice %1 {offsets = [1, 0], sizes = [30, 1], strides = [1, 1]} : vector<32x1xf32> to vector<30x1xf32>
    %c1 = arith.constant 1 : index
    %c0_4 = arith.constant 0 : index
    %8 = vector.load %arg2[%c1, %c0_4] : memref<3x32xf32, #tpu.memory_space<vmem>>, vector<1x32xf32>
    %9 = vector.broadcast %7 : vector<30x1xf32> to vector<30x32xf32>
    %10 = vector.broadcast %8 : vector<1x32xf32> to vector<30x32xf32>
    %11 = arith.mulf %9, %10 : vector<30x32xf32>
    %12 = arith.addf %6, %11 : vector<30x32xf32>
    %13 = vector.extract_strided_slice %1 {offsets = [2, 0], sizes = [30, 1], strides = [1, 1]} : vector<32x1xf32> to vector<30x1xf32>
    %c2 = arith.constant 2 : index
    %c0_5 = arith.constant 0 : index
    %14 = vector.load %arg2[%c2, %c0_5] : memref<3x32xf32, #tpu.memory_space<vmem>>, vector<1x32xf32>
    %15 = vector.broadcast %13 : vector<30x1xf32> to vector<30x32xf32>
    %16 = vector.broadcast %14 : vector<1x32xf32> to vector<30x32xf32>
    %17 = arith.mulf %15, %16 : vector<30x32xf32>
    %18 = arith.addf %12, %17 : vector<30x32xf32>
    %c0_6 = arith.constant 0 : index
    %c0_7 = arith.constant 0 : index
    %19 = vector.load %arg3[%c0_6, %c0_7] : memref<1x32xf32, #tpu.memory_space<vmem>>, vector<1x32xf32>
    %20 = vector.broadcast %19 : vector<1x32xf32> to vector<30x32xf32>
    %21 = arith.addf %18, %20 : vector<30x32xf32>
    %c0_8 = arith.constant 0 : index
    %c0_9 = arith.constant 0 : index
    %22 = vector.load %arg11[%c0_8, %c0_9] : memref<30x32xf32, #tpu.memory_space<vmem>>, vector<30x32xf32>
    tpu.vector_store %arg11[%c0_8, %c0_9], %21 {strides = array<i32>} : memref<30x32xf32, #tpu.memory_space<vmem>>, vector<30x32xf32>,
    %c0_10 = arith.constant 0 : index
    %c0_11 = arith.constant 0 : index
    %23 = tpu.strided_load %arg11[%c0_10, %c0_11] {strides = array<i32: 2, 1>} : memref<30x32xf32, #tpu.memory_space<vmem>>, vector<15x32xf32>
    %c1_12 = arith.constant 1 : index
    %c0_13 = arith.constant 0 : index
    %24 = tpu.strided_load %arg11[%c1_12, %c0_13] {strides = array<i32: 2, 1>} : memref<30x32xf32, #tpu.memory_space<vmem>>, vector<15x32xf32>
    %25 = arith.addf %23, %24 : vector<15x32xf32>
    %cst = arith.constant 5.000000e-01 : f32
    %26 = vector.broadcast %cst : f32 to vector<15x32xf32>
    %27 = arith.mulf %26, %25 : vector<15x32xf32>
    %28 = vector.extract_strided_slice %27 {offsets = [0, 0], sizes = [13, 32], strides = [1, 1]} : vector<15x32xf32> to vector<13x32xf32>
    %29 = arith.truncf %28 : vector<13x32xf32> to vector<13x32xbf16>
    %c0_14 = arith.constant 0 : index
    %c0_15 = arith.constant 0 : index
    %c0_16 = arith.constant 0 : index
    %30 = vector.load %arg4[%c0_14, %c0_15, %c0_16] : memref<3x32x32xbf16, #tpu.memory_space<vmem>>, vector<1x32x32xbf16>
    %31 = vector.shape_cast %30 : vector<1x32x32xbf16> to vector<32x32xbf16>
    %cst_17 = arith.constant dense<0.000000e+00> : vector<13x32xf32>
    %32 = tpu.matmul %29, %31, %cst_17 {dimension_numbers = #tpu.dot_dimension_numbers<[1], [0], [0], [1], [0, 0, 1, 1], [], []>} : vector<13x32xbf16>, vector<32x32xbf16>, vector<13x32xf32> -> vector<13x32xf32>
    %33 = vector.extract_strided_slice %27 {offsets = [1, 0], sizes = [13, 32], strides = [1, 1]} : vector<15x32xf32> to vector<13x32xf32>
    %34 = arith.truncf %33 : vector<13x32xf32> to vector<13x32xbf16>
    %c1_18 = arith.constant 1 : index
    %c0_19 = arith.constant 0 : index
    %c0_20 = arith.constant 0 : index
    %35 = vector.load %arg4[%c1_18, %c0_19, %c0_20] : memref<3x32x32xbf16, #tpu.memory_space<vmem>>, vector<1x32x32xbf16>
    %36 = vector.shape_cast %35 : vector<1x32x32xbf16> to vector<32x32xbf16>
    %cst_21 = arith.constant dense<0.000000e+00> : vector<13x32xf32>
    %37 = tpu.matmul %34, %36, %cst_21 {dimension_numbers = #tpu.dot_dimension_numbers<[1], [0], [0], [1], [0, 0, 1, 1], [], []>} : vector<13x32xbf16>, vector<32x32xbf16>, vector<13x32xf32> -> vector<13x32xf32>
    %38 = arith.addf %32, %37 : vector<13x32xf32>
    %39 = vector.extract_strided_slice %27 {offsets = [2, 0], sizes = [13, 32], strides = [1, 1]} : vector<15x32xf32> to vector<13x32xf32>
    %40 = arith.truncf %39 : vector<13x32xf32> to vector<13x32xbf16>
    %c2_22 = arith.constant 2 : index
    %c0_23 = arith.constant 0 : index
    %c0_24 = arith.constant 0 : index
    %41 = vector.load %arg4[%c2_22, %c0_23, %c0_24] : memref<3x32x32xbf16, #tpu.memory_space<vmem>>, vector<1x32x32xbf16>
    %42 = vector.shape_cast %41 : vector<1x32x32xbf16> to vector<32x32xbf16>
    %cst_25 = arith.constant dense<0.000000e+00> : vector<13x32xf32>
    %43 = tpu.matmul %40, %42, %cst_25 {dimension_numbers = #tpu.dot_dimension_numbers<[1], [0], [0], [1], [0, 0, 1, 1], [], []>} : vector<13x32xbf16>, vector<32x32xbf16>, vector<13x32xf32> -> vector<13x32xf32>
    %44 = arith.addf %38, %43 : vector<13x32xf32>
    %c0_26 = arith.constant 0 : index
    %c0_27 = arith.constant 0 : index
    %45 = vector.load %arg5[%c0_26, %c0_27] : memref<1x32xf32, #tpu.memory_space<vmem>>, vector<1x32xf32>
    %46 = vector.broadcast %45 : vector<1x32xf32> to vector<13x32xf32>
    %47 = arith.addf %44, %46 : vector<13x32xf32>
    %c0_28 = arith.constant 0 : index
    %c0_29 = arith.constant 0 : index
    %48 = vector.load %arg12[%c0_28, %c0_29] : memref<13x32xf32, #tpu.memory_space<vmem>>, vector<13x32xf32>
    tpu.vector_store %arg12[%c0_28, %c0_29], %47 {strides = array<i32>} : memref<13x32xf32, #tpu.memory_space<vmem>>, vector<13x32xf32>,
    %c0_30 = arith.constant 0 : index
    %c0_31 = arith.constant 0 : index
    %49 = tpu.strided_load %arg12[%c0_30, %c0_31] {strides = array<i32: 2, 1>} : memref<13x32xf32, #tpu.memory_space<vmem>>, vector<6x32xf32>
    %c1_32 = arith.constant 1 : index
    %c0_33 = arith.constant 0 : index
    %50 = tpu.strided_load %arg12[%c1_32, %c0_33] {strides = array<i32: 2, 1>} : memref<13x32xf32, #tpu.memory_space<vmem>>, vector<6x32xf32>
    %51 = arith.addf %49, %50 : vector<6x32xf32>
    %cst_34 = arith.constant 5.000000e-01 : f32
    %52 = vector.broadcast %cst_34 : f32 to vector<6x32xf32>
    %53 = arith.mulf %52, %51 : vector<6x32xf32>
    %54 = math.tanh %53 : vector<6x32xf32>
    %55 = arith.truncf %54 : vector<6x32xf32> to vector<6x32xbf16>
    %c0_35 = arith.constant 0 : index
    %c0_36 = arith.constant 0 : index
    %c0_37 = arith.constant 0 : index
    %56 = vector.load %arg10[%c0_35, %c0_36, %c0_37] : memref<1x6x32xbf16, #tpu.memory_space<vmem>>, vector<1x6x32xbf16>
    %57 = vector.shape_cast %56 : vector<1x6x32xbf16> to vector<6x32xbf16>
    %58 = vector.shape_cast %55 : vector<6x32xbf16> to vector<1x6x32xbf16>
    tpu.vector_store %arg10[%c0_35, %c0_36, %c0_37], %58 {strides = array<i32>} : memref<1x6x32xbf16, #tpu.memory_space<vmem>>, vector<1x6x32xbf16>,
    return
  }
  func.func @transform_0(%arg0: i32) -> (i32, i32, i32) {
    %c0_i32 = arith.constant 0 : i32
    %c0_i32_0 = arith.constant 0 : i32
    %c0_i32_1 = arith.constant 0 : i32
    return %arg0, %c0_i32, %c0_i32_0 : i32, i32, i32
  }
  func.func @transform_1(%arg0: i32) -> (i32, i32) {
    %c0_i32 = arith.constant 0 : i32
    %c0_i32_0 = arith.constant 0 : i32
    %c0_i32_1 = arith.constant 0 : i32
    return %c0_i32, %c0_i32_0 : i32, i32
  }
  func.func @transform_2(%arg0: i32) -> (i32, i32) {
    %c0_i32 = arith.constant 0 : i32
    %c0_i32_0 = arith.constant 0 : i32
    %c0_i32_1 = arith.constant 0 : i32
    return %c0_i32, %c0_i32_0 : i32, i32
  }
  func.func @transform_3(%arg0: i32) -> (i32, i32, i32) {
    %c0_i32 = arith.constant 0 : i32
    %c0_i32_0 = arith.constant 0 : i32
    %c0_i32_1 = arith.constant 0 : i32
    %c0_i32_2 = arith.constant 0 : i32
    return %c0_i32, %c0_i32_0, %c0_i32_1 : i32, i32, i32
  }
  func.func @transform_4(%arg0: i32) -> (i32, i32) {
    %c0_i32 = arith.constant 0 : i32
    %c0_i32_0 = arith.constant 0 : i32
    %c0_i32_1 = arith.constant 0 : i32
    return %c0_i32, %c0_i32_0 : i32, i32
  }
  func.func @transform_5(%arg0: i32) -> (i32, i32) {
    %c0_i32 = arith.constant 0 : i32
    %c0_i32_0 = arith.constant 0 : i32
    %c0_i32_1 = arith.constant 0 : i32
    return %c0_i32, %c0_i32_0 : i32, i32
  }
  func.func @transform_6(%arg0: i32) -> (i32, i32) {
    %c0_i32 = arith.constant 0 : i32
    %c0_i32_0 = arith.constant 0 : i32
    %c0_i32_1 = arith.constant 0 : i32
    return %c0_i32, %c0_i32_0 : i32, i32
  }
  func.func @transform_7(%arg0: i32) -> (i32, i32) {
    %c0_i32 = arith.constant 0 : i32
    %c0_i32_0 = arith.constant 0 : i32
    %c0_i32_1 = arith.constant 0 : i32
    return %c0_i32, %c0_i32_0 : i32, i32
  }
  func.func @transform_8(%arg0: i32) -> (i32, i32) {
    %c0_i32 = arith.constant 0 : i32
    %c0_i32_0 = arith.constant 0 : i32
    %c0_i32_1 = arith.constant 0 : i32
    return %c0_i32, %c0_i32_0 : i32, i32
  }
  func.func @transform_9(%arg0: i32) -> (i32, i32, i32) {
    %c0_i32 = arith.constant 0 : i32
    %c0_i32_0 = arith.constant 0 : i32
    %c0_i32_1 = arith.constant 0 : i32
    return %arg0, %c0_i32, %c0_i32_0 : i32, i32, i32
  }
}

module attributes {stable_mosaic.version = 11 : i64} {
  func.func @_conv_branch_kernel(%arg0: i32, %arg1: memref<1x32x1xf32, #tpu.memory_space<vmem>>, %arg2: memref<3x32xf32, #tpu.memory_space<vmem>>, %arg3: memref<1x32xf32, #tpu.memory_space<vmem>>, %arg4: memref<3x32x32xbf16, #tpu.memory_space<vmem>>, %arg5: memref<1x32xf32, #tpu.memory_space<vmem>>, %arg6: memref<1x32xf32, #tpu.memory_space<vmem>>, %arg7: memref<1x32xf32, #tpu.memory_space<vmem>>, %arg8: memref<1x32xf32, #tpu.memory_space<vmem>>, %arg9: memref<1x32xf32, #tpu.memory_space<vmem>>, %arg10: memref<1x6x32xbf16, #tpu.memory_space<vmem>>, %arg11: memref<30x32xf32, #tpu.memory_space<vmem>>, %arg12: memref<13x32xf32, #tpu.memory_space<vmem>>) attributes {dimension_semantics = [#tpu.dimension_semantics<parallel>], iteration_bounds = array<i64: 2>, scalar_prefetch = 0 : i64, scratch_operands = 2 : i64, tpu.core_type = #tpu.core_type<tc>, window_params = [{transform_indices = @transform_0, window_bounds = array<i64: 1, 32, 1>}, {pipeline_mode = #tpu.pipeline_mode<synchronous>, transform_indices = @transform_1, window_bounds = array<i64: 3, 32>}, {pipeline_mode = #tpu.pipeline_mode<synchronous>, transform_indices = @transform_2, window_bounds = array<i64: 1, 32>}, {pipeline_mode = #tpu.pipeline_mode<synchronous>, transform_indices = @transform_3, window_bounds = array<i64: 3, 32, 32>}, {pipeline_mode = #tpu.pipeline_mode<synchronous>, transform_indices = @transform_4, window_bounds = array<i64: 1, 32>}, {pipeline_mode = #tpu.pipeline_mode<synchronous>, transform_indices = @transform_5, window_bounds = array<i64: 1, 32>}, {pipeline_mode = #tpu.pipeline_mode<synchronous>, transform_indices = @transform_6, window_bounds = array<i64: 1, 32>}, {pipeline_mode = #tpu.pipeline_mode<synchronous>, transform_indices = @transform_7, window_bounds = array<i64: 1, 32>}, {pipeline_mode = #tpu.pipeline_mode<synchronous>, transform_indices = @transform_8, window_bounds = array<i64: 1, 32>}, {transform_indices = @transform_9, window_bounds = array<i64: 1, 6, 32>}]} {
    %c0 = arith.constant 0 : index
    %c0_0 = arith.constant 0 : index
    %c0_1 = arith.constant 0 : index
    %0 = vector.load %arg1[%c0, %c0_0, %c0_1] : memref<1x32x1xf32, #tpu.memory_space<vmem>>, vector<1x32x1xf32>
    %1 = vector.shape_cast %0 : vector<1x32x1xf32> to vector<32x1xf32>
    %2 = vector.extract_strided_slice %1 {offsets = [0, 0], sizes = [30, 1], strides = [1, 1]} : vector<32x1xf32> to vector<30x1xf32>
    %c0_2 = arith.constant 0 : index
    %c0_3 = arith.constant 0 : index
    %3 = vector.load %arg2[%c0_2, %c0_3] : memref<3x32xf32, #tpu.memory_space<vmem>>, vector<1x32xf32>
    %4 = vector.broadcast %2 : vector<30x1xf32> to vector<30x32xf32>
    %5 = vector.broadcast %3 : vector<1x32xf32> to vector<30x32xf32>
    %6 = arith.mulf %4, %5 : vector<30x32xf32>
    %7 = vector.extract_strided_slice %1 {offsets = [1, 0], sizes = [30, 1], strides = [1, 1]} : vector<32x1xf32> to vector<30x1xf32>
    %c1 = arith.constant 1 : index
    %c0_4 = arith.constant 0 : index
    %8 = vector.load %arg2[%c1, %c0_4] : memref<3x32xf32, #tpu.memory_space<vmem>>, vector<1x32xf32>
    %9 = vector.broadcast %7 : vector<30x1xf32> to vector<30x32xf32>
    %10 = vector.broadcast %8 : vector<1x32xf32> to vector<30x32xf32>
    %11 = arith.mulf %9, %10 : vector<30x32xf32>
    %12 = arith.addf %6, %11 : vector<30x32xf32>
    %13 = vector.extract_strided_slice %1 {offsets = [2, 0], sizes = [30, 1], strides = [1, 1]} : vector<32x1xf32> to vector<30x1xf32>
    %c2 = arith.constant 2 : index
    %c0_5 = arith.constant 0 : index
    %14 = vector.load %arg2[%c2, %c0_5] : memref<3x32xf32, #tpu.memory_space<vmem>>, vector<1x32xf32>
    %15 = vector.broadcast %13 : vector<30x1xf32> to vector<30x32xf32>
    %16 = vector.broadcast %14 : vector<1x32xf32> to vector<30x32xf32>
    %17 = arith.mulf %15, %16 : vector<30x32xf32>
    %18 = arith.addf %12, %17 : vector<30x32xf32>
    %c0_6 = arith.constant 0 : index
    %c0_7 = arith.constant 0 : index
    %19 = vector.load %arg3[%c0_6, %c0_7] : memref<1x32xf32, #tpu.memory_space<vmem>>, vector<1x32xf32>
    %20 = vector.broadcast %19 : vector<1x32xf32> to vector<30x32xf32>
    %21 = arith.addf %18, %20 : vector<30x32xf32>
    %c0_8 = arith.constant 0 : index
    %c0_9 = arith.constant 0 : index
    %22 = vector.load %arg6[%c0_8, %c0_9] : memref<1x32xf32, #tpu.memory_space<vmem>>, vector<1x32xf32>
    %23 = vector.broadcast %22 : vector<1x32xf32> to vector<30x32xf32>
    %24 = arith.mulf %21, %23 : vector<30x32xf32>
    %c0_10 = arith.constant 0 : index
    %c0_11 = arith.constant 0 : index
    %25 = vector.load %arg7[%c0_10, %c0_11] : memref<1x32xf32, #tpu.memory_space<vmem>>, vector<1x32xf32>
    %26 = vector.broadcast %25 : vector<1x32xf32> to vector<30x32xf32>
    %27 = arith.addf %24, %26 : vector<30x32xf32>
    %cst = arith.constant 0.000000e+00 : f32
    %28 = vector.broadcast %cst : f32 to vector<30x32xf32>
    %29 = arith.maximumf %27, %28 : vector<30x32xf32>
    %c0_12 = arith.constant 0 : index
    %c0_13 = arith.constant 0 : index
    %30 = vector.load %arg11[%c0_12, %c0_13] : memref<30x32xf32, #tpu.memory_space<vmem>>, vector<30x32xf32>
    tpu.vector_store %arg11[%c0_12, %c0_13], %29 {strides = array<i32>} : memref<30x32xf32, #tpu.memory_space<vmem>>, vector<30x32xf32>,
    %c0_14 = arith.constant 0 : index
    %c0_15 = arith.constant 0 : index
    %31 = tpu.strided_load %arg11[%c0_14, %c0_15] {strides = array<i32: 2, 1>} : memref<30x32xf32, #tpu.memory_space<vmem>>, vector<15x32xf32>
    %c1_16 = arith.constant 1 : index
    %c0_17 = arith.constant 0 : index
    %32 = tpu.strided_load %arg11[%c1_16, %c0_17] {strides = array<i32: 2, 1>} : memref<30x32xf32, #tpu.memory_space<vmem>>, vector<15x32xf32>
    %33 = arith.addf %31, %32 : vector<15x32xf32>
    %cst_18 = arith.constant 5.000000e-01 : f32
    %34 = vector.broadcast %cst_18 : f32 to vector<15x32xf32>
    %35 = arith.mulf %34, %33 : vector<15x32xf32>
    %36 = vector.extract_strided_slice %35 {offsets = [0, 0], sizes = [13, 32], strides = [1, 1]} : vector<15x32xf32> to vector<13x32xf32>
    %37 = arith.truncf %36 : vector<13x32xf32> to vector<13x32xbf16>
    %c0_19 = arith.constant 0 : index
    %c0_20 = arith.constant 0 : index
    %c0_21 = arith.constant 0 : index
    %38 = vector.load %arg4[%c0_19, %c0_20, %c0_21] : memref<3x32x32xbf16, #tpu.memory_space<vmem>>, vector<1x32x32xbf16>
    %39 = vector.shape_cast %38 : vector<1x32x32xbf16> to vector<32x32xbf16>
    %cst_22 = arith.constant dense<0.000000e+00> : vector<13x32xf32>
    %40 = tpu.matmul %37, %39, %cst_22 {dimension_numbers = #tpu.dot_dimension_numbers<[1], [0], [0], [1], [0, 0, 1, 1], [], []>} : vector<13x32xbf16>, vector<32x32xbf16>, vector<13x32xf32> -> vector<13x32xf32>
    %41 = vector.extract_strided_slice %35 {offsets = [1, 0], sizes = [13, 32], strides = [1, 1]} : vector<15x32xf32> to vector<13x32xf32>
    %42 = arith.truncf %41 : vector<13x32xf32> to vector<13x32xbf16>
    %c1_23 = arith.constant 1 : index
    %c0_24 = arith.constant 0 : index
    %c0_25 = arith.constant 0 : index
    %43 = vector.load %arg4[%c1_23, %c0_24, %c0_25] : memref<3x32x32xbf16, #tpu.memory_space<vmem>>, vector<1x32x32xbf16>
    %44 = vector.shape_cast %43 : vector<1x32x32xbf16> to vector<32x32xbf16>
    %cst_26 = arith.constant dense<0.000000e+00> : vector<13x32xf32>
    %45 = tpu.matmul %42, %44, %cst_26 {dimension_numbers = #tpu.dot_dimension_numbers<[1], [0], [0], [1], [0, 0, 1, 1], [], []>} : vector<13x32xbf16>, vector<32x32xbf16>, vector<13x32xf32> -> vector<13x32xf32>
    %46 = arith.addf %40, %45 : vector<13x32xf32>
    %47 = vector.extract_strided_slice %35 {offsets = [2, 0], sizes = [13, 32], strides = [1, 1]} : vector<15x32xf32> to vector<13x32xf32>
    %48 = arith.truncf %47 : vector<13x32xf32> to vector<13x32xbf16>
    %c2_27 = arith.constant 2 : index
    %c0_28 = arith.constant 0 : index
    %c0_29 = arith.constant 0 : index
    %49 = vector.load %arg4[%c2_27, %c0_28, %c0_29] : memref<3x32x32xbf16, #tpu.memory_space<vmem>>, vector<1x32x32xbf16>
    %50 = vector.shape_cast %49 : vector<1x32x32xbf16> to vector<32x32xbf16>
    %cst_30 = arith.constant dense<0.000000e+00> : vector<13x32xf32>
    %51 = tpu.matmul %48, %50, %cst_30 {dimension_numbers = #tpu.dot_dimension_numbers<[1], [0], [0], [1], [0, 0, 1, 1], [], []>} : vector<13x32xbf16>, vector<32x32xbf16>, vector<13x32xf32> -> vector<13x32xf32>
    %52 = arith.addf %46, %51 : vector<13x32xf32>
    %c0_31 = arith.constant 0 : index
    %c0_32 = arith.constant 0 : index
    %53 = vector.load %arg5[%c0_31, %c0_32] : memref<1x32xf32, #tpu.memory_space<vmem>>, vector<1x32xf32>
    %54 = vector.broadcast %53 : vector<1x32xf32> to vector<13x32xf32>
    %55 = arith.addf %52, %54 : vector<13x32xf32>
    %c0_33 = arith.constant 0 : index
    %c0_34 = arith.constant 0 : index
    %56 = vector.load %arg8[%c0_33, %c0_34] : memref<1x32xf32, #tpu.memory_space<vmem>>, vector<1x32xf32>
    %57 = vector.broadcast %56 : vector<1x32xf32> to vector<13x32xf32>
    %58 = arith.mulf %55, %57 : vector<13x32xf32>
    %c0_35 = arith.constant 0 : index
    %c0_36 = arith.constant 0 : index
    %59 = vector.load %arg9[%c0_35, %c0_36] : memref<1x32xf32, #tpu.memory_space<vmem>>, vector<1x32xf32>
    %60 = vector.broadcast %59 : vector<1x32xf32> to vector<13x32xf32>
    %61 = arith.addf %58, %60 : vector<13x32xf32>
    %cst_37 = arith.constant 0.000000e+00 : f32
    %62 = vector.broadcast %cst_37 : f32 to vector<13x32xf32>
    %63 = arith.maximumf %61, %62 : vector<13x32xf32>
    %c0_38 = arith.constant 0 : index
    %c0_39 = arith.constant 0 : index
    %64 = vector.load %arg12[%c0_38, %c0_39] : memref<13x32xf32, #tpu.memory_space<vmem>>, vector<13x32xf32>
    tpu.vector_store %arg12[%c0_38, %c0_39], %63 {strides = array<i32>} : memref<13x32xf32, #tpu.memory_space<vmem>>, vector<13x32xf32>,
    %c0_40 = arith.constant 0 : index
    %c0_41 = arith.constant 0 : index
    %65 = tpu.strided_load %arg12[%c0_40, %c0_41] {strides = array<i32: 2, 1>} : memref<13x32xf32, #tpu.memory_space<vmem>>, vector<6x32xf32>
    %c1_42 = arith.constant 1 : index
    %c0_43 = arith.constant 0 : index
    %66 = tpu.strided_load %arg12[%c1_42, %c0_43] {strides = array<i32: 2, 1>} : memref<13x32xf32, #tpu.memory_space<vmem>>, vector<6x32xf32>
    %67 = arith.addf %65, %66 : vector<6x32xf32>
    %cst_44 = arith.constant 5.000000e-01 : f32
    %68 = vector.broadcast %cst_44 : f32 to vector<6x32xf32>
    %69 = arith.mulf %68, %67 : vector<6x32xf32>
    %70 = math.tanh %69 : vector<6x32xf32>
    %71 = arith.truncf %70 : vector<6x32xf32> to vector<6x32xbf16>
    %c0_45 = arith.constant 0 : index
    %c0_46 = arith.constant 0 : index
    %c0_47 = arith.constant 0 : index
    %72 = vector.load %arg10[%c0_45, %c0_46, %c0_47] : memref<1x6x32xbf16, #tpu.memory_space<vmem>>, vector<1x6x32xbf16>
    %73 = vector.shape_cast %72 : vector<1x6x32xbf16> to vector<6x32xbf16>
    %74 = vector.shape_cast %71 : vector<6x32xbf16> to vector<1x6x32xbf16>
    tpu.vector_store %arg10[%c0_45, %c0_46, %c0_47], %74 {strides = array<i32>} : memref<1x6x32xbf16, #tpu.memory_space<vmem>>, vector<1x6x32xbf16>,
    return
  }
  func.func @transform_0(%arg0: i32) -> (i32, i32, i32) {
    %c0_i32 = arith.constant 0 : i32
    %c0_i32_0 = arith.constant 0 : i32
    %c0_i32_1 = arith.constant 0 : i32
    return %arg0, %c0_i32, %c0_i32_0 : i32, i32, i32
  }
  func.func @transform_1(%arg0: i32) -> (i32, i32) {
    %c0_i32 = arith.constant 0 : i32
    %c0_i32_0 = arith.constant 0 : i32
    %c0_i32_1 = arith.constant 0 : i32
    return %c0_i32, %c0_i32_0 : i32, i32
  }
  func.func @transform_2(%arg0: i32) -> (i32, i32) {
    %c0_i32 = arith.constant 0 : i32
    %c0_i32_0 = arith.constant 0 : i32
    %c0_i32_1 = arith.constant 0 : i32
    return %c0_i32, %c0_i32_0 : i32, i32
  }
  func.func @transform_3(%arg0: i32) -> (i32, i32, i32) {
    %c0_i32 = arith.constant 0 : i32
    %c0_i32_0 = arith.constant 0 : i32
    %c0_i32_1 = arith.constant 0 : i32
    %c0_i32_2 = arith.constant 0 : i32
    return %c0_i32, %c0_i32_0, %c0_i32_1 : i32, i32, i32
  }
  func.func @transform_4(%arg0: i32) -> (i32, i32) {
    %c0_i32 = arith.constant 0 : i32
    %c0_i32_0 = arith.constant 0 : i32
    %c0_i32_1 = arith.constant 0 : i32
    return %c0_i32, %c0_i32_0 : i32, i32
  }
  func.func @transform_5(%arg0: i32) -> (i32, i32) {
    %c0_i32 = arith.constant 0 : i32
    %c0_i32_0 = arith.constant 0 : i32
    %c0_i32_1 = arith.constant 0 : i32
    return %c0_i32, %c0_i32_0 : i32, i32
  }
  func.func @transform_6(%arg0: i32) -> (i32, i32) {
    %c0_i32 = arith.constant 0 : i32
    %c0_i32_0 = arith.constant 0 : i32
    %c0_i32_1 = arith.constant 0 : i32
    return %c0_i32, %c0_i32_0 : i32, i32
  }
  func.func @transform_7(%arg0: i32) -> (i32, i32) {
    %c0_i32 = arith.constant 0 : i32
    %c0_i32_0 = arith.constant 0 : i32
    %c0_i32_1 = arith.constant 0 : i32
    return %c0_i32, %c0_i32_0 : i32, i32
  }
  func.func @transform_8(%arg0: i32) -> (i32, i32) {
    %c0_i32 = arith.constant 0 : i32
    %c0_i32_0 = arith.constant 0 : i32
    %c0_i32_1 = arith.constant 0 : i32
    return %c0_i32, %c0_i32_0 : i32, i32
  }
  func.func @transform_9(%arg0: i32) -> (i32, i32, i32) {
    %c0_i32 = arith.constant 0 : i32
    %c0_i32_0 = arith.constant 0 : i32
    %c0_i32_1 = arith.constant 0 : i32
    return %arg0, %c0_i32, %c0_i32_0 : i32, i32, i32
  }
}

module attributes {stable_mosaic.version = 11 : i64} {
  func.func @_gru_dir_kernel(%arg0: i32, %arg1: memref<2x6x32xbf16, #tpu.memory_space<vmem>>, %arg2: memref<2x6x32xbf16, #tpu.memory_space<vmem>>, %arg3: memref<1x64x192xbf16, #tpu.memory_space<vmem>>, %arg4: memref<1x64x192xbf16, #tpu.memory_space<vmem>>, %arg5: memref<1x1x192xf32, #tpu.memory_space<vmem>>, %arg6: memref<1x1x192xf32, #tpu.memory_space<vmem>>, %arg7: memref<1x2x64xf32, #tpu.memory_space<vmem>>, %arg8: memref<2x6x192xf32, #tpu.memory_space<vmem>>) attributes {dimension_semantics = [#tpu.dimension_semantics<parallel>], iteration_bounds = array<i64: 2>, scalar_prefetch = 0 : i64, scratch_operands = 1 : i64, tpu.core_type = #tpu.core_type<tc>, window_params = [{pipeline_mode = #tpu.pipeline_mode<synchronous>, transform_indices = @transform_0, window_bounds = array<i64: 2, 6, 32>}, {pipeline_mode = #tpu.pipeline_mode<synchronous>, transform_indices = @transform_1, window_bounds = array<i64: 2, 6, 32>}, {transform_indices = @transform_2, window_bounds = array<i64: 1, 64, 192>}, {transform_indices = @transform_3, window_bounds = array<i64: 1, 64, 192>}, {transform_indices = @transform_4, window_bounds = array<i64: 1, 1, 192>}, {transform_indices = @transform_5, window_bounds = array<i64: 1, 1, 192>}, {transform_indices = @transform_6, window_bounds = array<i64: 1, 2, 64>}]} {
    %c0 = arith.constant 0 : index
    %c0_0 = arith.constant 0 : index
    %c0_1 = arith.constant 0 : index
    %0 = vector.load %arg1[%c0, %c0_0, %c0_1] : memref<2x6x32xbf16, #tpu.memory_space<vmem>>, vector<1x6x32xbf16>
    %1 = vector.shape_cast %0 : vector<1x6x32xbf16> to vector<6x32xbf16>
    %c0_2 = arith.constant 0 : index
    %c0_3 = arith.constant 0 : index
    %c0_4 = arith.constant 0 : index
    %2 = vector.load %arg3[%c0_2, %c0_3, %c0_4] : memref<1x64x192xbf16, #tpu.memory_space<vmem>>, vector<1x32x192xbf16>
    %3 = vector.shape_cast %2 : vector<1x32x192xbf16> to vector<32x192xbf16>
    %cst = arith.constant dense<0.000000e+00> : vector<6x192xf32>
    %4 = tpu.matmul %1, %3, %cst {dimension_numbers = #tpu.dot_dimension_numbers<[1], [0], [0], [1], [0, 0, 1, 1], [], []>} : vector<6x32xbf16>, vector<32x192xbf16>, vector<6x192xf32> -> vector<6x192xf32>
    %c0_5 = arith.constant 0 : index
    %c0_6 = arith.constant 0 : index
    %c0_7 = arith.constant 0 : index
    %5 = vector.load %arg2[%c0_5, %c0_6, %c0_7] : memref<2x6x32xbf16, #tpu.memory_space<vmem>>, vector<1x6x32xbf16>
    %6 = vector.shape_cast %5 : vector<1x6x32xbf16> to vector<6x32xbf16>
    %c0_8 = arith.constant 0 : index
    %c32 = arith.constant 32 : index
    %c0_9 = arith.constant 0 : index
    %7 = vector.load %arg3[%c0_8, %c32, %c0_9] : memref<1x64x192xbf16, #tpu.memory_space<vmem>>, vector<1x32x192xbf16>
    %8 = vector.shape_cast %7 : vector<1x32x192xbf16> to vector<32x192xbf16>
    %cst_10 = arith.constant dense<0.000000e+00> : vector<6x192xf32>
    %9 = tpu.matmul %6, %8, %cst_10 {dimension_numbers = #tpu.dot_dimension_numbers<[1], [0], [0], [1], [0, 0, 1, 1], [], []>} : vector<6x32xbf16>, vector<32x192xbf16>, vector<6x192xf32> -> vector<6x192xf32>
    %10 = arith.addf %4, %9 : vector<6x192xf32>
    %c0_11 = arith.constant 0 : index
    %c0_12 = arith.constant 0 : index
    %c0_13 = arith.constant 0 : index
    %11 = vector.load %arg5[%c0_11, %c0_12, %c0_13] : memref<1x1x192xf32, #tpu.memory_space<vmem>>, vector<1x1x192xf32>
    %12 = vector.shape_cast %11 : vector<1x1x192xf32> to vector<1x192xf32>
    %13 = vector.broadcast %12 : vector<1x192xf32> to vector<6x192xf32>
    %14 = arith.addf %10, %13 : vector<6x192xf32>
    %c0_14 = arith.constant 0 : index
    %c0_15 = arith.constant 0 : index
    %c0_16 = arith.constant 0 : index
    %15 = vector.load %arg8[%c0_14, %c0_15, %c0_16] : memref<2x6x192xf32, #tpu.memory_space<vmem>>, vector<1x6x192xf32>
    %16 = vector.shape_cast %15 : vector<1x6x192xf32> to vector<6x192xf32>
    %17 = vector.shape_cast %14 : vector<6x192xf32> to vector<1x6x192xf32>
    tpu.vector_store %arg8[%c0_14, %c0_15, %c0_16], %17 {strides = array<i32>} : memref<2x6x192xf32, #tpu.memory_space<vmem>>, vector<1x6x192xf32>,
    %c1 = arith.constant 1 : index
    %c0_17 = arith.constant 0 : index
    %c0_18 = arith.constant 0 : index
    %18 = vector.load %arg1[%c1, %c0_17, %c0_18] : memref<2x6x32xbf16, #tpu.memory_space<vmem>>, vector<1x6x32xbf16>
    %19 = vector.shape_cast %18 : vector<1x6x32xbf16> to vector<6x32xbf16>
    %c0_19 = arith.constant 0 : index
    %c0_20 = arith.constant 0 : index
    %c0_21 = arith.constant 0 : index
    %20 = vector.load %arg3[%c0_19, %c0_20, %c0_21] : memref<1x64x192xbf16, #tpu.memory_space<vmem>>, vector<1x32x192xbf16>
    %21 = vector.shape_cast %20 : vector<1x32x192xbf16> to vector<32x192xbf16>
    %cst_22 = arith.constant dense<0.000000e+00> : vector<6x192xf32>
    %22 = tpu.matmul %19, %21, %cst_22 {dimension_numbers = #tpu.dot_dimension_numbers<[1], [0], [0], [1], [0, 0, 1, 1], [], []>} : vector<6x32xbf16>, vector<32x192xbf16>, vector<6x192xf32> -> vector<6x192xf32>
    %c1_23 = arith.constant 1 : index
    %c0_24 = arith.constant 0 : index
    %c0_25 = arith.constant 0 : index
    %23 = vector.load %arg2[%c1_23, %c0_24, %c0_25] : memref<2x6x32xbf16, #tpu.memory_space<vmem>>, vector<1x6x32xbf16>
    %24 = vector.shape_cast %23 : vector<1x6x32xbf16> to vector<6x32xbf16>
    %c0_26 = arith.constant 0 : index
    %c32_27 = arith.constant 32 : index
    %c0_28 = arith.constant 0 : index
    %25 = vector.load %arg3[%c0_26, %c32_27, %c0_28] : memref<1x64x192xbf16, #tpu.memory_space<vmem>>, vector<1x32x192xbf16>
    %26 = vector.shape_cast %25 : vector<1x32x192xbf16> to vector<32x192xbf16>
    %cst_29 = arith.constant dense<0.000000e+00> : vector<6x192xf32>
    %27 = tpu.matmul %24, %26, %cst_29 {dimension_numbers = #tpu.dot_dimension_numbers<[1], [0], [0], [1], [0, 0, 1, 1], [], []>} : vector<6x32xbf16>, vector<32x192xbf16>, vector<6x192xf32> -> vector<6x192xf32>
    %28 = arith.addf %22, %27 : vector<6x192xf32>
    %c0_30 = arith.constant 0 : index
    %c0_31 = arith.constant 0 : index
    %c0_32 = arith.constant 0 : index
    %29 = vector.load %arg5[%c0_30, %c0_31, %c0_32] : memref<1x1x192xf32, #tpu.memory_space<vmem>>, vector<1x1x192xf32>
    %30 = vector.shape_cast %29 : vector<1x1x192xf32> to vector<1x192xf32>
    %31 = vector.broadcast %30 : vector<1x192xf32> to vector<6x192xf32>
    %32 = arith.addf %28, %31 : vector<6x192xf32>
    %c1_33 = arith.constant 1 : index
    %c0_34 = arith.constant 0 : index
    %c0_35 = arith.constant 0 : index
    %33 = vector.load %arg8[%c1_33, %c0_34, %c0_35] : memref<2x6x192xf32, #tpu.memory_space<vmem>>, vector<1x6x192xf32>
    %34 = vector.shape_cast %33 : vector<1x6x192xf32> to vector<6x192xf32>
    %35 = vector.shape_cast %32 : vector<6x192xf32> to vector<1x6x192xf32>
    tpu.vector_store %arg8[%c1_33, %c0_34, %c0_35], %35 {strides = array<i32>} : memref<2x6x192xf32, #tpu.memory_space<vmem>>, vector<1x6x192xf32>,
    %cst_36 = arith.constant 0.000000e+00 : f32
    %36 = vector.broadcast %cst_36 : f32 to vector<2x64xf32>
    %c0_i32 = arith.constant 0 : i32
    %c6_i32 = arith.constant 6 : i32
    %37 = arith.addi %c0_i32, %c6_i32 : i32
    %c1_i32 = arith.constant 1 : i32
    %38 = scf.for %arg9 = %c0_i32 to %37 step %c1_i32 iter_args(%arg10 = %36) -> (vector<2x64xf32>)  : i32 {
      %c0_i32_41 = arith.constant 0 : i32
      %42 = arith.cmpi eq, %arg0, %c0_i32_41 : i32
      %c5_i32 = arith.constant 5 : i32
      %43 = arith.subi %c5_i32, %arg9 : i32
      %44 = arith.select %42, %arg9, %43 : i32
      %c0_42 = arith.constant 0 : index
      %45 = arith.index_cast %44 : i32 to index
      %c0_43 = arith.constant 0 : index
      %46 = vector.load %arg8[%c0_42, %45, %c0_43] : memref<2x6x192xf32, #tpu.memory_space<vmem>>, vector<1x1x192xf32>
      %47 = vector.shape_cast %46 : vector<1x1x192xf32> to vector<1x192xf32>
      %c1_44 = arith.constant 1 : index
      %48 = arith.index_cast %44 : i32 to index
      %c0_45 = arith.constant 0 : index
      %49 = vector.load %arg8[%c1_44, %48, %c0_45] : memref<2x6x192xf32, #tpu.memory_space<vmem>>, vector<1x1x192xf32>
      %50 = vector.shape_cast %49 : vector<1x1x192xf32> to vector<1x192xf32>
      %51 = tpu.concatenate %47, %50 in 0 : vector<1x192xf32>, vector<1x192xf32> -> vector<2x192xf32>
      %52 = arith.truncf %arg10 : vector<2x64xf32> to vector<2x64xbf16>
      %c0_46 = arith.constant 0 : index
      %c0_47 = arith.constant 0 : index
      %c0_48 = arith.constant 0 : index
      %53 = vector.load %arg4[%c0_46, %c0_47, %c0_48] : memref<1x64x192xbf16, #tpu.memory_space<vmem>>, vector<1x64x192xbf16>
      %54 = vector.shape_cast %53 : vector<1x64x192xbf16> to vector<64x192xbf16>
      %cst_49 = arith.constant dense<0.000000e+00> : vector<2x192xf32>
      %55 = tpu.matmul %52, %54, %cst_49 {dimension_numbers = #tpu.dot_dimension_numbers<[1], [0], [0], [1], [0, 0, 1, 1], [], []>} : vector<2x64xbf16>, vector<64x192xbf16>, vector<2x192xf32> -> vector<2x192xf32>
      %c0_50 = arith.constant 0 : index
      %c0_51 = arith.constant 0 : index
      %c0_52 = arith.constant 0 : index
      %56 = vector.load %arg6[%c0_50, %c0_51, %c0_52] : memref<1x1x192xf32, #tpu.memory_space<vmem>>, vector<1x1x192xf32>
      %57 = vector.shape_cast %56 : vector<1x1x192xf32> to vector<1x192xf32>
      %58 = vector.broadcast %57 : vector<1x192xf32> to vector<2x192xf32>
      %59 = arith.addf %55, %58 : vector<2x192xf32>
      %60 = vector.extract_strided_slice %51 {offsets = [0, 0], sizes = [2, 64], strides = [1, 1]} : vector<2x192xf32> to vector<2x64xf32>
      %61 = vector.extract_strided_slice %59 {offsets = [0, 0], sizes = [2, 64], strides = [1, 1]} : vector<2x192xf32> to vector<2x64xf32>
      %62 = arith.addf %60, %61 : vector<2x64xf32>
      %63 = arith.negf %62 : vector<2x64xf32>
      %64 = math.exp %63 : vector<2x64xf32>
      %cst_53 = arith.constant 1.000000e+00 : f32
      %65 = vector.broadcast %cst_53 : f32 to vector<2x64xf32>
      %66 = arith.addf %65, %64 : vector<2x64xf32>
      %67 = arith.divf %65, %66 : vector<2x64xf32>
      %68 = vector.extract_strided_slice %51 {offsets = [0, 64], sizes = [2, 64], strides = [1, 1]} : vector<2x192xf32> to vector<2x64xf32>
      %69 = vector.extract_strided_slice %59 {offsets = [0, 64], sizes = [2, 64], strides = [1, 1]} : vector<2x192xf32> to vector<2x64xf32>
      %70 = arith.addf %68, %69 : vector<2x64xf32>
      %71 = arith.negf %70 : vector<2x64xf32>
      %72 = math.exp %71 : vector<2x64xf32>
      %cst_54 = arith.constant 1.000000e+00 : f32
      %73 = vector.broadcast %cst_54 : f32 to vector<2x64xf32>
      %74 = arith.addf %73, %72 : vector<2x64xf32>
      %75 = arith.divf %73, %74 : vector<2x64xf32>
      %76 = vector.extract_strided_slice %51 {offsets = [0, 128], sizes = [2, 64], strides = [1, 1]} : vector<2x192xf32> to vector<2x64xf32>
      %77 = vector.extract_strided_slice %59 {offsets = [0, 128], sizes = [2, 64], strides = [1, 1]} : vector<2x192xf32> to vector<2x64xf32>
      %78 = arith.mulf %67, %77 : vector<2x64xf32>
      %79 = arith.addf %76, %78 : vector<2x64xf32>
      %80 = math.tanh %79 : vector<2x64xf32>
      %cst_55 = arith.constant 1.000000e+00 : f32
      %81 = vector.broadcast %cst_55 : f32 to vector<2x64xf32>
      %82 = arith.subf %81, %75 : vector<2x64xf32>
      %83 = arith.mulf %82, %80 : vector<2x64xf32>
      %84 = arith.mulf %75, %arg10 : vector<2x64xf32>
      %85 = arith.addf %83, %84 : vector<2x64xf32>
      scf.yield %85 : vector<2x64xf32>
    }
    %c6_i32_37 = arith.constant 6 : i32
    %c0_38 = arith.constant 0 : index
    %c0_39 = arith.constant 0 : index
    %c0_40 = arith.constant 0 : index
    %39 = vector.load %arg7[%c0_38, %c0_39, %c0_40] : memref<1x2x64xf32, #tpu.memory_space<vmem>>, vector<1x2x64xf32>
    %40 = vector.shape_cast %39 : vector<1x2x64xf32> to vector<2x64xf32>
    %41 = vector.shape_cast %38 : vector<2x64xf32> to vector<1x2x64xf32>
    tpu.vector_store %arg7[%c0_38, %c0_39, %c0_40], %41 {strides = array<i32>} : memref<1x2x64xf32, #tpu.memory_space<vmem>>, vector<1x2x64xf32>,
    return
  }
  func.func @transform_0(%arg0: i32) -> (i32, i32, i32) {
    %c0_i32 = arith.constant 0 : i32
    %c0_i32_0 = arith.constant 0 : i32
    %c0_i32_1 = arith.constant 0 : i32
    %c0_i32_2 = arith.constant 0 : i32
    return %c0_i32, %c0_i32_0, %c0_i32_1 : i32, i32, i32
  }
  func.func @transform_1(%arg0: i32) -> (i32, i32, i32) {
    %c0_i32 = arith.constant 0 : i32
    %c0_i32_0 = arith.constant 0 : i32
    %c0_i32_1 = arith.constant 0 : i32
    %c0_i32_2 = arith.constant 0 : i32
    return %c0_i32, %c0_i32_0, %c0_i32_1 : i32, i32, i32
  }
  func.func @transform_2(%arg0: i32) -> (i32, i32, i32) {
    %c0_i32 = arith.constant 0 : i32
    %c0_i32_0 = arith.constant 0 : i32
    %c0_i32_1 = arith.constant 0 : i32
    return %arg0, %c0_i32, %c0_i32_0 : i32, i32, i32
  }
  func.func @transform_3(%arg0: i32) -> (i32, i32, i32) {
    %c0_i32 = arith.constant 0 : i32
    %c0_i32_0 = arith.constant 0 : i32
    %c0_i32_1 = arith.constant 0 : i32
    return %arg0, %c0_i32, %c0_i32_0 : i32, i32, i32
  }
  func.func @transform_4(%arg0: i32) -> (i32, i32, i32) {
    %c0_i32 = arith.constant 0 : i32
    %c0_i32_0 = arith.constant 0 : i32
    %c0_i32_1 = arith.constant 0 : i32
    return %arg0, %c0_i32, %c0_i32_0 : i32, i32, i32
  }
  func.func @transform_5(%arg0: i32) -> (i32, i32, i32) {
    %c0_i32 = arith.constant 0 : i32
    %c0_i32_0 = arith.constant 0 : i32
    %c0_i32_1 = arith.constant 0 : i32
    return %arg0, %c0_i32, %c0_i32_0 : i32, i32, i32
  }
  func.func @transform_6(%arg0: i32) -> (i32, i32, i32) {
    %c0_i32 = arith.constant 0 : i32
    %c0_i32_0 = arith.constant 0 : i32
    %c0_i32_1 = arith.constant 0 : i32
    return %arg0, %c0_i32, %c0_i32_0 : i32, i32, i32
  }
}

module attributes {stable_mosaic.version = 11 : i64} {
  func.func @_ffn_kernel(%arg0: memref<2x2x64xf32, #tpu.memory_space<vmem>>, %arg1: memref<128x64xbf16, #tpu.memory_space<vmem>>, %arg2: memref<1x64xf32, #tpu.memory_space<vmem>>, %arg3: memref<64x1xbf16, #tpu.memory_space<vmem>>, %arg4: memref<1x1xf32, #tpu.memory_space<vmem>>, %arg5: memref<2x1xf32, #tpu.memory_space<vmem>>) attributes {dimension_semantics = [], scalar_prefetch = 0 : i64, scratch_operands = 0 : i64, tpu.core_type = #tpu.core_type<tc>} {
    %c0 = arith.constant 0 : index
    %c0_0 = arith.constant 0 : index
    %c0_1 = arith.constant 0 : index
    %0 = vector.load %arg0[%c0, %c0_0, %c0_1] : memref<2x2x64xf32, #tpu.memory_space<vmem>>, vector<1x2x64xf32>
    %1 = vector.shape_cast %0 : vector<1x2x64xf32> to vector<2x64xf32>
    %2 = arith.truncf %1 : vector<2x64xf32> to vector<2x64xbf16>
    %c1 = arith.constant 1 : index
    %c0_2 = arith.constant 0 : index
    %c0_3 = arith.constant 0 : index
    %3 = vector.load %arg0[%c1, %c0_2, %c0_3] : memref<2x2x64xf32, #tpu.memory_space<vmem>>, vector<1x2x64xf32>
    %4 = vector.shape_cast %3 : vector<1x2x64xf32> to vector<2x64xf32>
    %5 = arith.truncf %4 : vector<2x64xf32> to vector<2x64xbf16>
    %c0_4 = arith.constant 0 : index
    %c0_5 = arith.constant 0 : index
    %6 = vector.load %arg1[%c0_4, %c0_5] : memref<128x64xbf16, #tpu.memory_space<vmem>>, vector<64x64xbf16>
    %cst = arith.constant dense<0.000000e+00> : vector<2x64xf32>
    %7 = tpu.matmul %2, %6, %cst {dimension_numbers = #tpu.dot_dimension_numbers<[1], [0], [0], [1], [0, 0, 1, 1], [], []>} : vector<2x64xbf16>, vector<64x64xbf16>, vector<2x64xf32> -> vector<2x64xf32>
    %c64 = arith.constant 64 : index
    %c0_6 = arith.constant 0 : index
    %8 = vector.load %arg1[%c64, %c0_6] : memref<128x64xbf16, #tpu.memory_space<vmem>>, vector<64x64xbf16>
    %cst_7 = arith.constant dense<0.000000e+00> : vector<2x64xf32>
    %9 = tpu.matmul %5, %8, %cst_7 {dimension_numbers = #tpu.dot_dimension_numbers<[1], [0], [0], [1], [0, 0, 1, 1], [], []>} : vector<2x64xbf16>, vector<64x64xbf16>, vector<2x64xf32> -> vector<2x64xf32>
    %10 = arith.addf %7, %9 : vector<2x64xf32>
    %c0_8 = arith.constant 0 : index
    %c0_9 = arith.constant 0 : index
    %11 = vector.load %arg2[%c0_8, %c0_9] : memref<1x64xf32, #tpu.memory_space<vmem>>, vector<1x64xf32>
    %12 = vector.broadcast %11 : vector<1x64xf32> to vector<2x64xf32>
    %13 = arith.addf %10, %12 : vector<2x64xf32>
    %cst_10 = arith.constant 0.000000e+00 : f32
    %14 = vector.broadcast %cst_10 : f32 to vector<2x64xf32>
    %15 = arith.maximumf %13, %14 : vector<2x64xf32>
    %16 = arith.truncf %15 : vector<2x64xf32> to vector<2x64xbf16>
    %c0_11 = arith.constant 0 : index
    %c0_12 = arith.constant 0 : index
    %17 = vector.load %arg3[%c0_11, %c0_12] : memref<64x1xbf16, #tpu.memory_space<vmem>>, vector<64x1xbf16>
    %cst_13 = arith.constant dense<0.000000e+00> : vector<2x1xf32>
    %18 = tpu.matmul %16, %17, %cst_13 {dimension_numbers = #tpu.dot_dimension_numbers<[1], [0], [0], [1], [0, 0, 1, 1], [], []>} : vector<2x64xbf16>, vector<64x1xbf16>, vector<2x1xf32> -> vector<2x1xf32>
    %c0_14 = arith.constant 0 : index
    %c0_15 = arith.constant 0 : index
    %19 = vector.load %arg4[%c0_14, %c0_15] : memref<1x1xf32, #tpu.memory_space<vmem>>, vector<1x1xf32>
    %20 = vector.broadcast %19 : vector<1x1xf32> to vector<2x1xf32>
    %21 = arith.addf %18, %20 : vector<2x1xf32>
    %c0_16 = arith.constant 0 : index
    %c0_17 = arith.constant 0 : index
    %22 = vector.load %arg5[%c0_16, %c0_17] : memref<2x1xf32, #tpu.memory_space<vmem>>, vector<2x1xf32>
    tpu.vector_store %arg5[%c0_16, %c0_17], %21 {strides = array<i32>} : memref<2x1xf32, #tpu.memory_space<vmem>>, vector<2x1xf32>,
    return
  }
}

</mosaic_0001>

<bundles_post_ra>
// kernel: mhc_model_forward.4
= control target key start
LH: loop header
LB: loop body
LE: loop exit
PB: predicated region body
PF: predicated region fallthrough
CT: control target
= control target key end

     0   :  { %s916_s30 = smov 0   ;;  %s1007_s0 = inlined_call_operand.vmem [shape: f32[2,32,1], index: 0, kind: input, shape index: {}]   ;;  %s1008_s1 = inlined_call_operand.vmem [shape: f32[3,32], index: 1, kind: input, shape index: {}]   ;;  %s1009_s2 = inlined_call_operand.vmem [shape: f32[1,32], index: 2, kind: input, shape index: {}]   ;;  %s1010_s3 = inlined_call_operand.vmem [shape: bf16[3,32,32], index: 3, kind: input, shape index: {}]   ;;  %s1011_s4 = inlined_call_operand.vmem [shape: f32[1,32], index: 4, kind: input, shape index: {}]   ;;  %s1012_s5 = inlined_call_operand.vmem [shape: f32[1,32], index: 5, kind: input, shape index: {}]   ;;  %s1013_s6 = inlined_call_operand.vmem [shape: f32[1,32], index: 6, kind: input, shape index: {}]   ;;  %s1014_s7 = inlined_call_operand.vmem [shape: f32[1,32], index: 7, kind: input, shape index: {}]   ;;  %s1015_s8 = inlined_call_operand.vmem [shape: f32[1,32], index: 8, kind: input, shape index: {}]   ;;  %s1016_s9 = inlined_call_operand.vmem [shape: bf16[2,6,32], index: 9, kind: output, shape index: {}]  }
   0x1 LB: > { %s764_s10 = sadd.s32 4294967295, %s861_s30   ;;  %p768_p0 = scmp.ge.s32.totalorder %s861_s30, 1  ;;  %s861_s30 = sphi %s916_s30, %s19_s30  }
   0x2   : > { %p287_p1 = scmp.lt.s32.totalorder %s861_s30, 3 }
   0x4   : > { %p288_p2 = pnand %p768_p0, %p287_p1 }
   0x5   : > { %p322_p3 = scmp.lt.s32.totalorder (!%p288_p2), %s764_s10, 1  ;;  %v863_v0 = vmov (!%p288_p2), 0   ;;  %v847_v5 = vld [vmem:[%s1010_s3] sm:$0xff] (!%p288_p2)   ;;  %v849_v6 = vld [vmem:[%s1010_s3 + $0x10] sm:$0xff] (!%p288_p2)   ;;  %v864_v7 = vmov (!%p288_p2), 0.0   ;;  %v848_v8 = vld [vmem:[%s1010_s3 + $0x8] sm:$0xff] (!%p288_p2)  }
   0x6   : > { %291 = sbr.rel (%p288_p2) target bundleno = 445 (0x1bd), region = 56  ;;  %846 = vset.pattern.permute.xlu1 (!%p288_p2), %v863_v0  ;;  %845 = vset.pattern.permute.xlu0 (!%p288_p2), %v863_v0  ;;  %vm865_vm0 = vmmov (!%p288_p2), 0   ;;  %v850_v9 = vld [vmem:[%s1010_s3 + $0x18] sm:$0xff] (!%p288_p2)   ;;  %v773_v10 = vld [vmem:[%s1008_s1 + $0x1] ss:$0 sm:$0xff] (!%p288_p2)  ;;  %vm378_vm1 = vcmask (!%p288_p2), 1046528  }
   0x7   : > { %818 = vmatprep.subr.bf16.mxu1 (!%p288_p2), %v864_v7  ;;  %810 = vmatprep.subr.bf16.mxu0 (!%p288_p2), %v864_v7  ;;  %v774_v13 = vld [vmem:[%s1008_s1 + $0x2] ss:$0 sm:$0xff] (!%p288_p2)  ;;  %v772_v14 = vld [vmem:[%s1008_s1] ss:$0 sm:$0xff] (!%p288_p2)  ;;  %vm407_vm2 = vcmask (!%p288_p2), 1045504   ;;  %vm464_vm3 = vcmask (!%p288_p2), 259072  }
   0x8   : > { %819 = vmatpush3.bf16.msra.mxu1 (!%p288_p2), %v847_v5  ;;  %811 = vmatpush3.bf16.msra.mxu0 (!%p288_p2), %v849_v6  ;;  %v775_v39 = vld [vmem:[%s1009_s2] ss:$0 sm:$0xff] (!%p288_p2)  ;;  %vm460_vm4 = vcmask (!%p288_p2), 261120   ;;  %vm700_vm5 = vcmask (!%p288_p2), 258048   ;;  %vm709_vm6 = vcmask (!%p288_p2), 256000  }
   0x9   : > { %820 = vmatprep.subr.bf16.mxu1 (!%p288_p2), %v864_v7  ;;  %822 = vmatprep.mubr.msk.bf16.mxu1 (!%p288_p2), %vm865_vm0, %v864_v7  ;;  %v776_v47 = vld [vmem:[%s1012_s5] ss:$0 sm:$0xff] (!%p288_p2) }
   0xa   : > { %812 = vmatprep.subr.bf16.mxu0 (!%p288_p2), %v864_v7  ;;  %814 = vmatprep.mubr.msk.bf16.mxu0 (!%p288_p2), %vm865_vm0, %v864_v7  ;;  %v777_v54 = vld [vmem:[%s1013_s6] ss:$0 sm:$0xff] (!%p288_p2) }
   0xc   : > { %821 = vmatpush3.bf16.msra.mxu1 (!%p288_p2), %v848_v8  ;;  %813 = vmatpush3.bf16.msra.mxu0 (!%p288_p2), %v850_v9 }
   0xd   : > { %s1018_s10 = smov (!%p322_p3, %s764_s10), 1  ;;  %826 = vmatprep.subr.bf16.mxu0 %v864_v7 }
   0xe   : > { %s800_s11 = sshll.u32 %s1018_s10, 5  ;;  %s771_s26 = sshll.u32 %s1018_s10, 2 }
   0xf   : > { %s326_s14 = scalar_lea.vmem %s1007_s0, %s800_s11  ;;  %s330_s29 = scalar_lea.vmem %s1016_s9, %s771_s26 }
  0x10   : > { %v334_v1 = vld [vmem:[%s326_s14 + $0x10] sm:$0xff]  ;;  %v332_v2 = vld [vmem:[%s326_s14] sm:$0xff]  ;;  %v335_v3 = vld [vmem:[%s326_s14 + $0x18] sm:$0xff] }
  0x11   : > { %349 = vperm.xlu1 %846, %v334_v1   ;;  %339 = vperm.xlu0 %845, %v332_v2   ;;  %v333_v4 = vld [vmem:[%s326_s14 + $0x8] sm:$0xff] }
  0x15   : > { %354 = vperm.xlu1 %846, %v335_v3   ;;  %344 = vperm.xlu0 %845, %v333_v4  }
  0x90   : > { %v350_v11 = vpop.permute.xlu1 %349  ;;  %v340_v12 = vpop.permute.xlu0 %339 }
  0x91   : > { %v372_v15 = vmul.f32 %v773_v10, %v350_v11  ;;  %v370_v16 = vmul.f32 %v773_v10, %v340_v12  ;;  %v401_v19 = vmul.f32 %v774_v13, %v350_v11  ;;  %v363_v22 = vmul.f32 %v772_v14, %v350_v11 }
  0x92   : > { %v399_v23 = vmul.f32 %v774_v13, %v340_v12  ;;  %v361_v30 = vmul.f32 %v772_v14, %v340_v12 }
  0x93   : > { %v382_v26 = vrot.slane %v372_v15, 1  ;;  %v379_v31 = vrot.slane %v370_v16, 1  ;;  %v411_v34 = vrot.slane %v401_v19, 2  ;;  %v851_v19 = vld [vmem:[%s1010_s3 + $0x20] sm:$0xff]  }
  0x94   : > { %v355_v17 = vpop.permute.xlu1 %354  ;;  %v345_v18 = vpop.permute.xlu0 %344  ;;  %v408_v38 = vrot.slane %v399_v23, 2 }
  0x95   : > { %v373_v20 = vmul.f32 %v773_v10, %v355_v17  ;;  %v402_v21 = vmul.f32 %v774_v13, %v355_v17  ;;  %v371_v24 = vmul.f32 %v773_v10, %v345_v18  ;;  %v400_v25 = vmul.f32 %v774_v13, %v345_v18 }
  0x96   : > { %v364_v27 = vmul.f32 %v772_v14, %v355_v17  ;;  %v362_v37 = vmul.f32 %v772_v14, %v345_v18 }
  0x97   : > { %v384_v28 = vrot.slane %v373_v20, 1  ;;  %v413_v29 = vrot.slane %v402_v21, 2  ;;  %v380_v32 = vrot.slane %v371_v24, 1  ;;  %v409_v33 = vrot.slane %v400_v25, 2  ;;  %v852_v21 = vld [vmem:[%s1010_s3 + $0x28] sm:$0xff]  }
  0x99   : > { %v385_v35 = vsel %vm378_vm1, %v382_v26, %v384_v28  ;;  %v393_v36 = vadd.f32 %v384_v28, %v364_v27  ;;  %v381_v41 = vsel %vm378_vm1, %v379_v31, %v380_v32  ;;  %v383_v42 = vsel %vm378_vm1, %v380_v32, %v382_v26 }
  0x9a   : > { %v392_v40 = vadd.f32 %v385_v35, %v363_v22  ;;  %v414_v43 = vsel %vm407_vm2, %v411_v34, %v413_v29  ;;  %v390_v45 = vadd.f32 %v381_v41, %v361_v30  ;;  %v391_v46 = vadd.f32 %v383_v42, %v362_v37  ;;  %v797_v41 = vld [vmem:[%s1015_s8] ss:$0 sm:$0xff] }
  0x9b   : > { %v422_v44 = vadd.f32 %v413_v29, %v393_v36  ;;  %v410_v49 = vsel %vm407_vm2, %v408_v38, %v409_v33  ;;  %v412_v50 = vsel %vm407_vm2, %v409_v33, %v411_v34  ;;  %v795_v34 = vld [vmem:[%s1011_s4] ss:$0 sm:$0xff] }
  0x9c   : > { %v421_v48 = vadd.f32 %v414_v43, %v392_v40  ;;  %v419_v52 = vadd.f32 %v410_v49, %v390_v45  ;;  %v420_v53 = vadd.f32 %v412_v50, %v391_v46  ;;  %v796_v36 = vld [vmem:[%s1014_s7] ss:$0 sm:$0xff] }
  0x9d   : > { %v433_v51 = vadd.f32 %v775_v39, %v422_v44 }
  0x9e   : > { %v432_v55 = vadd.f32 %v775_v39, %v421_v48  ;;  %v430_v57 = vadd.f32 %v775_v39, %v419_v52  ;;  %v431_v58 = vadd.f32 %v775_v39, %v420_v53 }
  0x9f   : > { %v444_v56 = vmul.f32 %v776_v47, %v433_v51 }
  0xa0   : > { %v443_v59 = vmul.f32 %v776_v47, %v432_v55  ;;  %v441_v61 = vmul.f32 %v776_v47, %v430_v57  ;;  %v442_v62 = vmul.f32 %v776_v47, %v431_v58 }
  0xa1   : > { %v455_v60 = vadd.f32 %v777_v54, %v444_v56 }
  0xa2   : > { %v454_v63 = vadd.f32 %v777_v54, %v443_v59  ;;  %v452_v1 = vadd.f32 %v777_v54, %v441_v61  ;;  %v453_v2 = vadd.f32 %v777_v54, %v442_v62 }
  0xa3   : > { %v459_v0 = vmax.f32 %v455_v60, 0.0 }
  0xa4   : > { %v458_v3 = vmax.f32 %v454_v63, 0.0  ;;  %v456_v4 = vmax.f32 %v452_v1, 0.0  ;;  %v457_v5 = vmax.f32 %v453_v2, 0.0 }
  0xa5   : > { %465 = vst.msk [vmem:[#allocation2 + $0x18] sm:$0x3f] %vm464_vm3, %v459_v0 }
  0xa6   : > { %463 = vst.msk [vmem:[#allocation2 + $0x10] sm:$0xff] %vm460_vm4, %v458_v3  ;;  %461 = vst.msk [vmem:[#allocation2] sm:$0xff] %vm460_vm4, %v456_v4 }
  0xa7   : > { %462 = vst.msk [vmem:[#allocation2 + $0x8] sm:$0xff] %vm460_vm4, %v457_v5 }
  0xad   : > { %v468_v6 = vld [vmem:[#allocation2 + $0x10] ss:$2 sm:$0x7f]  ;;  %v472_v8 = vld [vmem:[#allocation2 + $0x11] ss:$2 sm:$0x7f] }
  0xae   : > { %v466_v9 = vld [vmem:[#allocation2] ss:$2 sm:$0xff]  ;;  %v470_v10 = vld [vmem:[#allocation2 + $0x1] ss:$2 sm:$0xff]  ;;  %v474_v11 = vadd.f32 %v472_v8, %v468_v6 }
  0xaf   : > { %v473_v12 = vadd.f32 %v470_v10, %v466_v9 }
  0xb0   : > { %v476_v13 = vmul.f32 0.5, %v474_v11 }
  0xb1   : > { %v475_v14 = vmul.f32 0.5, %v473_v12 }
  0xb3   : > { %v477_v15 = vpack.c.bf16 %v476_v13, %v475_v14 }
  0xb5   : > { %823 = vmatmul.mubr.msk.bf16.vlgmr.msra.gmra.mrb[0].mxu1 %vm460_vm4, %v477_v15  ;;  %v490_v16 = vshll.u32 %v477_v15, 16  ;;  %v488_v17 = vshrl.u32 %v477_v15, 16  ;;  %v611_v22 = vrot.slane %v477_v15, 1 }
  0xb7   : > { %v492_v18 = vrot.slane %v490_v16, 1 }
  0xb9   : > { %v493_v20 = vor.u32 %v492_v18, %v488_v17 }
  0xbb   : > { %815 = vmatmul.mubr.msk.bf16.vlgmr.msra.gmra.mrb[0].mxu0 %vm460_vm4, %v493_v20 }
  0xbc   : > { %827 = vmatpush3.bf16.msra.mxu0 %v851_v19  ;;  %830 = vmatprep.mubr.msk.bf16.mxu0 %vm865_vm0, %v864_v7 }
  0xbd   : > { %828 = vmatprep.subr.bf16.mxu0 %v864_v7 }
  0xc0   : > { %829 = vmatpush3.bf16.msra.mxu0 %v852_v21 }
  0xc3   : > { %831 = vmatmul.mubr.msk.bf16.vlgmr.msra.gmra.mrb[4].mxu0 %vm460_vm4, %v611_v22 }
 0x188   : > { %v598_v23 = vpop.f32.mrb[0].mxu1 }
 0x189   : > { %v824_v24 = vpop.f32.mrb[1].mxu1 }
 0x18a   : > { %v601_v25 = vpop.f32.mrb[2].mxu1 }
 0x18b   : > { %v825_v26 = vpop.f32.mrb[3].mxu1 }
 0x18e   : > { %v543_v27 = vpop.f32.mrb[0].mxu0 }
 0x18f   : > { %v599_v28 = vadd.f32 %v598_v23, %v543_v27  ;;  %v816_v29 = vpop.f32.mrb[1].mxu0 }
 0x190   : > { %v546_v30 = vpop.f32.mrb[2].mxu0 }
 0x191   : > { %v602_v31 = vadd.f32 %v601_v25, %v546_v30  ;;  %v817_v32 = vpop.f32.mrb[3].mxu0 }
 0x196   : > { %v661_v33 = vpop.f32.mrb[4].mxu0 }
 0x197   : > { %v668_v7 = vadd.f32 %v661_v33, %v599_v28  ;;  %v832_v35 = vpop.f32.mrb[5].mxu0 }
 0x198   : > { %v664_v37 = vpop.f32.mrb[6].mxu0 }
 0x199   : > { %v677_v38 = vadd.f32 %v795_v34, %v668_v7  ;;  %v669_v39 = vadd.f32 %v664_v37, %v602_v31  ;;  %v833_v40 = vpop.f32.mrb[7].mxu0 }
 0x19b   : > { %v686_v42 = vmul.f32 %v796_v36, %v677_v38  ;;  %v678_v43 = vadd.f32 %v795_v34, %v669_v39 }
 0x19d   : > { %v695_v44 = vadd.f32 %v797_v41, %v686_v42  ;;  %v687_v45 = vmul.f32 %v796_v36, %v678_v43 }
 0x19f   : > { %v697_v46 = vmax.f32 %v695_v44, 0.0  ;;  %v696_v47 = vadd.f32 %v797_v41, %v687_v45 }
 0x1a1   : > { %699 = vst.msk [vmem:[#allocation3] sm:$0xff] %vm460_vm4, %v697_v46  ;;  %v698_v48 = vmax.f32 %v696_v47, 0.0 }
 0x1a3   : > { %701 = vst.msk [vmem:[#allocation3 + $0x8] sm:$0x1f] %vm700_vm5, %v698_v48 }
 0x1aa   : > { %v702_v49 = vld [vmem:[#allocation3] ss:$2 sm:$0x3f]  ;;  %v704_v50 = vld [vmem:[#allocation3 + $0x1] ss:$2 sm:$0x3f] }
 0x1ab   : > { %v705_v51 = vadd.f32 %v704_v50, %v702_v49 }
 0x1ad   : > { %v706_v52 = vmul.f32 0.5, %v705_v51 }
 0x1af   : > { %853 = vtanh.f32 %v706_v52 }
 0x1b9   : > { %v854_v53 = vpop.eup %853 }
 0x1ba   : > { %v708_v54 = vpack.c.bf16 %v854_v53, %v854_v53 }
 0x1bc   : > { %710 = vst.msk [vmem:[%s330_s29] sm:$0x7] %vm709_vm6, %v708_v54 }
 0x1bd PF: > { %s19_s30 = sadd.s32 1, %s861_s30  }
 0x1be   : > { %p16_p4 = scmp.ge.s32.totalorder %s19_s30, 4  }
 0x1c0   :  { %18 = sbr.rel (!%p16_p4) target bundleno = 1 (0x1), region = 92 }

// kernel: mhc_model_forward.5
= control target key start
LH: loop header
LB: loop body
LE: loop exit
PB: predicated region body
PF: predicated region fallthrough
CT: control target
= control target key end

     0   :  { %s866_s30 = smov 0   ;;  %s945_s0 = inlined_call_operand.vmem [shape: f32[2,32,1], index: 0, kind: input, shape index: {}]   ;;  %s946_s1 = inlined_call_operand.vmem [shape: f32[3,32], index: 1, kind: input, shape index: {}]   ;;  %s947_s2 = inlined_call_operand.vmem [shape: f32[1,32], index: 2, kind: input, shape index: {}]   ;;  %s948_s3 = inlined_call_operand.vmem [shape: bf16[3,32,32], index: 3, kind: input, shape index: {}]   ;;  %s949_s4 = inlined_call_operand.vmem [shape: f32[1,32], index: 4, kind: input, shape index: {}]   ;;  %s950_s5 = inlined_call_operand.vmem [shape: f32[1,32], index: 5, kind: input, shape index: {}]   ;;  %s951_s6 = inlined_call_operand.vmem [shape: f32[1,32], index: 6, kind: input, shape index: {}]   ;;  %s952_s7 = inlined_call_operand.vmem [shape: f32[1,32], index: 7, kind: input, shape index: {}]   ;;  %s953_s8 = inlined_call_operand.vmem [shape: f32[1,32], index: 8, kind: input, shape index: {}]   ;;  %s954_s9 = inlined_call_operand.vmem [shape: bf16[2,6,32], index: 9, kind: output, shape index: {}]  }
   0x1 LB: > { %s718_s5 = sadd.s32 4294967295, %s811_s30   ;;  %p722_p0 = scmp.ge.s32.totalorder %s811_s30, 1  ;;  %s811_s30 = sphi %s866_s30, %s19_s30  }
   0x2   : > { %p287_p1 = scmp.lt.s32.totalorder %s811_s30, 3 }
   0x4   : > { %p288_p2 = pnand %p722_p0, %p287_p1 }
   0x5   : > { %p322_p3 = scmp.lt.s32.totalorder (!%p288_p2), %s718_s5, 1  ;;  %v813_v0 = vmov (!%p288_p2), 0   ;;  %v797_v5 = vld [vmem:[%s948_s3] sm:$0xff] (!%p288_p2)   ;;  %v799_v6 = vld [vmem:[%s948_s3 + $0x10] sm:$0xff] (!%p288_p2)   ;;  %v814_v7 = vmov (!%p288_p2), 0.0   ;;  %v798_v8 = vld [vmem:[%s948_s3 + $0x8] sm:$0xff] (!%p288_p2)  }
   0x6   : > { %291 = sbr.rel (%p288_p2) target bundleno = 433 (0x1b1), region = 56  ;;  %796 = vset.pattern.permute.xlu1 (!%p288_p2), %v813_v0  ;;  %795 = vset.pattern.permute.xlu0 (!%p288_p2), %v813_v0  ;;  %vm815_vm0 = vmmov (!%p288_p2), 0   ;;  %v800_v9 = vld [vmem:[%s948_s3 + $0x18] sm:$0xff] (!%p288_p2)   ;;  %v727_v10 = vld [vmem:[%s946_s1 + $0x1] ss:$0 sm:$0xff] (!%p288_p2)  ;;  %vm378_vm1 = vcmask (!%p288_p2), 1046528  }
   0x7   : > { %768 = vmatprep.subr.bf16.mxu1 (!%p288_p2), %v814_v7  ;;  %760 = vmatprep.subr.bf16.mxu0 (!%p288_p2), %v814_v7  ;;  %v728_v13 = vld [vmem:[%s946_s1 + $0x2] ss:$0 sm:$0xff] (!%p288_p2)  ;;  %v726_v14 = vld [vmem:[%s946_s1] ss:$0 sm:$0xff] (!%p288_p2)  ;;  %vm407_vm2 = vcmask (!%p288_p2), 1045504   ;;  %vm438_vm3 = vcmask (!%p288_p2), 259072  }
   0x8   : > { %769 = vmatpush3.bf16.msra.mxu1 (!%p288_p2), %v797_v5  ;;  %761 = vmatpush3.bf16.msra.mxu0 (!%p288_p2), %v799_v6  ;;  %v729_v39 = vld [vmem:[%s947_s2] ss:$0 sm:$0xff] (!%p288_p2)  ;;  %vm434_vm4 = vcmask (!%p288_p2), 261120   ;;  %v802_v6 = vld [vmem:[%s948_s3 + $0x28] sm:$0xff] (!%p288_p2)   ;;  %vm654_vm5 = vcmask (!%p288_p2), 258048   ;;  %vm663_vm6 = vcmask (!%p288_p2), 256000  }
   0x9   : > { %770 = vmatprep.subr.bf16.mxu1 (!%p288_p2), %v814_v7  ;;  %772 = vmatprep.mubr.msk.bf16.mxu1 (!%p288_p2), %vm815_vm0, %v814_v7 }
   0xa   : > { %762 = vmatprep.subr.bf16.mxu0 (!%p288_p2), %v814_v7  ;;  %764 = vmatprep.mubr.msk.bf16.mxu0 (!%p288_p2), %vm815_vm0, %v814_v7 }
   0xc   : > { %771 = vmatpush3.bf16.msra.mxu1 (!%p288_p2), %v798_v8  ;;  %763 = vmatpush3.bf16.msra.mxu0 (!%p288_p2), %v800_v9 }
   0xd   : > { %s956_s5 = smov (!%p322_p3, %s718_s5), 1  ;;  %776 = vmatprep.subr.bf16.mxu0 %v814_v7 }
   0xe   : > { %s750_s6 = sshll.u32 %s956_s5, 5 }
   0xf   : > { %s326_s10 = scalar_lea.vmem %s945_s0, %s750_s6 }
  0x10   : > { %v334_v1 = vld [vmem:[%s326_s10 + $0x10] sm:$0xff]  ;;  %v332_v2 = vld [vmem:[%s326_s10] sm:$0xff]  ;;  %v335_v3 = vld [vmem:[%s326_s10 + $0x18] sm:$0xff] }
  0x11   : > { %349 = vperm.xlu1 %796, %v334_v1   ;;  %339 = vperm.xlu0 %795, %v332_v2   ;;  %v333_v4 = vld [vmem:[%s326_s10 + $0x8] sm:$0xff]  ;;  %s725_s10 = sshll.u32 %s956_s5, 2 }
  0x12   : > { %s330_s13 = scalar_lea.vmem %s954_s9, %s725_s10 }
  0x15   : > { %354 = vperm.xlu1 %796, %v335_v3   ;;  %344 = vperm.xlu0 %795, %v333_v4   ;;  %v801_v4 = vld [vmem:[%s948_s3 + $0x20] sm:$0xff]  }
  0x90   : > { %v350_v11 = vpop.permute.xlu1 %349  ;;  %v340_v12 = vpop.permute.xlu0 %339 }
  0x91   : > { %v372_v15 = vmul.f32 %v727_v10, %v350_v11  ;;  %v370_v16 = vmul.f32 %v727_v10, %v340_v12  ;;  %v401_v19 = vmul.f32 %v728_v13, %v350_v11  ;;  %v363_v22 = vmul.f32 %v726_v14, %v350_v11 }
  0x92   : > { %v399_v23 = vmul.f32 %v728_v13, %v340_v12  ;;  %v361_v30 = vmul.f32 %v726_v14, %v340_v12 }
  0x93   : > { %v382_v26 = vrot.slane %v372_v15, 1  ;;  %v379_v31 = vrot.slane %v370_v16, 1  ;;  %v411_v34 = vrot.slane %v401_v19, 2 }
  0x94   : > { %v355_v17 = vpop.permute.xlu1 %354  ;;  %v345_v18 = vpop.permute.xlu0 %344  ;;  %v408_v38 = vrot.slane %v399_v23, 2 }
  0x95   : > { %v373_v20 = vmul.f32 %v727_v10, %v355_v17  ;;  %v402_v21 = vmul.f32 %v728_v13, %v355_v17  ;;  %v371_v24 = vmul.f32 %v727_v10, %v345_v18  ;;  %v400_v25 = vmul.f32 %v728_v13, %v345_v18 }
  0x96   : > { %v364_v27 = vmul.f32 %v726_v14, %v355_v17  ;;  %v362_v37 = vmul.f32 %v726_v14, %v345_v18 }
  0x97   : > { %v384_v28 = vrot.slane %v373_v20, 1  ;;  %v413_v29 = vrot.slane %v402_v21, 2  ;;  %v380_v32 = vrot.slane %v371_v24, 1  ;;  %v409_v33 = vrot.slane %v400_v25, 2  ;;  %v747_v20 = vld [vmem:[%s949_s4] ss:$0 sm:$0xff] }
  0x99   : > { %v385_v35 = vsel %vm378_vm1, %v382_v26, %v384_v28  ;;  %v393_v36 = vadd.f32 %v384_v28, %v364_v27  ;;  %v381_v41 = vsel %vm378_vm1, %v379_v31, %v380_v32  ;;  %v383_v42 = vsel %vm378_vm1, %v380_v32, %v382_v26 }
  0x9a   : > { %v392_v40 = vadd.f32 %v385_v35, %v363_v22  ;;  %v414_v43 = vsel %vm407_vm2, %v411_v34, %v413_v29  ;;  %v390_v45 = vadd.f32 %v381_v41, %v361_v30  ;;  %v391_v46 = vadd.f32 %v383_v42, %v362_v37 }
  0x9b   : > { %v422_v44 = vadd.f32 %v413_v29, %v393_v36  ;;  %v410_v48 = vsel %vm407_vm2, %v408_v38, %v409_v33  ;;  %v412_v49 = vsel %vm407_vm2, %v409_v33, %v411_v34 }
  0x9c   : > { %v421_v47 = vadd.f32 %v414_v43, %v392_v40  ;;  %v419_v51 = vadd.f32 %v410_v48, %v390_v45  ;;  %v420_v52 = vadd.f32 %v412_v49, %v391_v46 }
  0x9d   : > { %v433_v50 = vadd.f32 %v729_v39, %v422_v44 }
  0x9e   : > { %v432_v53 = vadd.f32 %v729_v39, %v421_v47  ;;  %v430_v54 = vadd.f32 %v729_v39, %v419_v51  ;;  %v431_v55 = vadd.f32 %v729_v39, %v420_v52 }
  0x9f   : > { %439 = vst.msk [vmem:[#allocation2 + $0x18] sm:$0x3f] %vm438_vm3, %v433_v50 }
  0xa0   : > { %437 = vst.msk [vmem:[#allocation2 + $0x10] sm:$0xff] %vm434_vm4, %v432_v53  ;;  %435 = vst.msk [vmem:[#allocation2] sm:$0xff] %vm434_vm4, %v430_v54 }
  0xa1   : > { %436 = vst.msk [vmem:[#allocation2 + $0x8] sm:$0xff] %vm434_vm4, %v431_v55 }
  0xa7   : > { %v442_v56 = vld [vmem:[#allocation2 + $0x10] ss:$2 sm:$0x7f]  ;;  %v446_v57 = vld [vmem:[#allocation2 + $0x11] ss:$2 sm:$0x7f] }
  0xa8   : > { %v440_v58 = vld [vmem:[#allocation2] ss:$2 sm:$0xff]  ;;  %v444_v59 = vld [vmem:[#allocation2 + $0x1] ss:$2 sm:$0xff]  ;;  %v448_v60 = vadd.f32 %v446_v57, %v442_v56 }
  0xa9   : > { %v447_v61 = vadd.f32 %v444_v59, %v440_v58 }
  0xaa   : > { %v450_v62 = vmul.f32 0.5, %v448_v60 }
  0xab   : > { %v449_v63 = vmul.f32 0.5, %v447_v61 }
  0xad   : > { %v451_v0 = vpack.c.bf16 %v450_v62, %v449_v63 }
  0xaf   : > { %773 = vmatmul.mubr.msk.bf16.vlgmr.msra.gmra.mrb[0].mxu1 %vm434_vm4, %v451_v0  ;;  %v464_v1 = vshll.u32 %v451_v0, 16  ;;  %v462_v2 = vshrl.u32 %v451_v0, 16  ;;  %v585_v8 = vrot.slane %v451_v0, 1 }
  0xb1   : > { %v466_v3 = vrot.slane %v464_v1, 1 }
  0xb3   : > { %v467_v5 = vor.u32 %v466_v3, %v462_v2 }
  0xb5   : > { %765 = vmatmul.mubr.msk.bf16.vlgmr.msra.gmra.mrb[0].mxu0 %vm434_vm4, %v467_v5 }
  0xb6   : > { %777 = vmatpush3.bf16.msra.mxu0 %v801_v4  ;;  %780 = vmatprep.mubr.msk.bf16.mxu0 %vm815_vm0, %v814_v7 }
  0xb7   : > { %778 = vmatprep.subr.bf16.mxu0 %v814_v7 }
  0xba   : > { %779 = vmatpush3.bf16.msra.mxu0 %v802_v6 }
  0xbd   : > { %781 = vmatmul.mubr.msk.bf16.vlgmr.msra.gmra.mrb[4].mxu0 %vm434_vm4, %v585_v8 }
 0x182   : > { %v572_v9 = vpop.f32.mrb[0].mxu1 }
 0x183   : > { %v774_v10 = vpop.f32.mrb[1].mxu1 }
 0x184   : > { %v575_v11 = vpop.f32.mrb[2].mxu1 }
 0x185   : > { %v775_v12 = vpop.f32.mrb[3].mxu1 }
 0x188   : > { %v517_v13 = vpop.f32.mrb[0].mxu0 }
 0x189   : > { %v573_v14 = vadd.f32 %v572_v9, %v517_v13  ;;  %v766_v15 = vpop.f32.mrb[1].mxu0 }
 0x18a   : > { %v520_v16 = vpop.f32.mrb[2].mxu0 }
 0x18b   : > { %v576_v17 = vadd.f32 %v575_v11, %v520_v16  ;;  %v767_v18 = vpop.f32.mrb[3].mxu0 }
 0x190   : > { %v635_v19 = vpop.f32.mrb[4].mxu0 }
 0x191   : > { %v642_v7 = vadd.f32 %v635_v19, %v573_v14  ;;  %v782_v21 = vpop.f32.mrb[5].mxu0 }
 0x192   : > { %v638_v22 = vpop.f32.mrb[6].mxu0 }
 0x193   : > { %v651_v23 = vadd.f32 %v747_v20, %v642_v7  ;;  %v643_v24 = vadd.f32 %v638_v22, %v576_v17  ;;  %v783_v25 = vpop.f32.mrb[7].mxu0 }
 0x195   : > { %653 = vst.msk [vmem:[#allocation3] sm:$0xff] %vm434_vm4, %v651_v23  ;;  %v652_v26 = vadd.f32 %v747_v20, %v643_v24 }
 0x197   : > { %655 = vst.msk [vmem:[#allocation3 + $0x8] sm:$0x1f] %vm654_vm5, %v652_v26 }
 0x19e   : > { %v656_v27 = vld [vmem:[#allocation3] ss:$2 sm:$0x3f]  ;;  %v658_v28 = vld [vmem:[#allocation3 + $0x1] ss:$2 sm:$0x3f] }
 0x19f   : > { %v659_v29 = vadd.f32 %v658_v28, %v656_v27 }
 0x1a1   : > { %v660_v30 = vmul.f32 0.5, %v659_v29 }
 0x1a3   : > { %803 = vtanh.f32 %v660_v30 }
 0x1ad   : > { %v804_v31 = vpop.eup %803 }
 0x1ae   : > { %v662_v32 = vpack.c.bf16 %v804_v31, %v804_v31 }
 0x1b0   : > { %664 = vst.msk [vmem:[%s330_s13] sm:$0x7] %vm663_vm6, %v662_v32 }
 0x1b1 PF: > { %s19_s30 = sadd.s32 1, %s811_s30  }
 0x1b2   : > { %p16_p4 = scmp.ge.s32.totalorder %s19_s30, 4  }
 0x1b4   :  { %18 = sbr.rel (!%p16_p4) target bundleno = 1 (0x1), region = 92 }

// kernel: mhc_model_forward.6
= control target key start
LH: loop header
LB: loop body
LE: loop exit
PB: predicated region body
PF: predicated region fallthrough
CT: control target
= control target key end

     0   :  { %s1076_s21 = smov 0   ;;  %s1192_s0 = inlined_call_operand.vmem [shape: bf16[2,6,32], index: 0, kind: input, shape index: {}]   ;;  %s1193_s1 = inlined_call_operand.vmem [shape: bf16[2,6,32], index: 1, kind: input, shape index: {}]   ;;  %s1194_s2 = inlined_call_operand.vmem [shape: bf16[2,64,192], index: 2, kind: input, shape index: {}]   ;;  %s1195_s3 = inlined_call_operand.vmem [shape: bf16[2,64,192], index: 3, kind: input, shape index: {}]   ;;  %s1196_s4 = inlined_call_operand.vmem [shape: f32[2,1,192], index: 4, kind: input, shape index: {}]   ;;  %s1197_s5 = inlined_call_operand.vmem [shape: f32[2,1,192], index: 5, kind: input, shape index: {}]   ;;  %s1198_s6 = inlined_call_operand.vmem [shape: f32[2,2,64], index: 6, kind: output, shape index: {}]  }
   0x1 LB: > { %s1082_s22 = sadd.s32 4294967295, %s1027_s21   ;;  %p906_p0 = scmp.ge.s32.totalorder %s1027_s21, 1  ;;  %s1027_s21 = sphi %s1076_s21, %s16_s21  }
   0x2   : > { %p240_p1 = scmp.lt.s32.totalorder %s1027_s21, 3 }
   0x4   : > { %p241_p2 = pnand %p906_p0, %p240_p1 }
   0x5   : > { %p282_p3 = scmp.lt.s32.totalorder (!%p241_p2), %s1082_s22, 1  ;;  %v1037_v0 = vmov (!%p241_p2), 0   ;;  %v310_v9 = vld [vmem:[%s1193_s1] sm:$0x7] (!%p241_p2)  ;;  %vm335_vm0 = vcmask (!%p241_p2), 261120   ;;  %v446_v13 = vlaneseq (!%p241_p2)  ;;  %vm459_vm1 = vcmask (!%p241_p2), 521216  }
   0x6   : > { %244 = sbr.rel (%p241_p2) target bundleno = 862 (0x35e), region = 44  ;;  %371 = vmatprep.mubr.bf16.mxu0 (!%p241_p2), %v1037_v0  ;;  %435 = vmatprep.mubr.bf16.mxu1 (!%p241_p2), %v1037_v0  ;;  %v305_v10 = vld [vmem:[%s1192_s0] sm:$0x7] (!%p241_p2)  ;;  %v925_v11 = vld [vmem:[%s1193_s1 + $0x4] sm:$0x7] (!%p241_p2)  ;;  %v1140_v47 = vmov (!%p241_p2), 0.0  }
   0x7   : > { %v924_v12 = vld [vmem:[%s1192_s0 + $0x4] sm:$0x7] (!%p241_p2)  ;;  %v447_v14 = vshrl.u32 (!%p241_p2), %v446_v13, 7 }
   0x9   : > { %v1130_v15 = vsub.s32 (!%p241_p2), 0, %v447_v14  ;;  %v1132_v17 = vsub.s32 (!%p241_p2), 1, %v447_v14 }
   0xd   : > { %s1088_s23 = scalar_select %p282_p3, %s1082_s22, 1 }
   0xf   : > { %s952_s24 = sshll.u32 %s1088_s23, 6  ;;  %s1116_s15 = sshll.u32 %s1088_s23, 1 }
  0x10   : > { %s286_s27 = scalar_lea.vmem %s1194_s2, %s952_s24  ;;  %s1097_s30 = scalar_lea.vmem %s1195_s3, %s952_s24 }
  0x11   : > { %v983_v1 = vld [vmem:[%s286_s27 + $0x24] ss:$8 sps:$4 sm:$0xff]   ;;  %v987_v3 = vld [vmem:[%s286_s27 + $0x20] ss:$8 sps:$4 sm:$0xff]   ;;  %v989_v5 = vld [vmem:[%s286_s27 + $0x34] ss:$8 sps:$4 sm:$0xff]   ;;  %s299_s18 = scalar_lea.vmem %s1197_s5, %s1116_s15  ;;  %s303_s24 = scalar_lea.vmem %s1198_s6, %s1116_s15 }
  0x12   : > { %v985_v2 = vld [vmem:[%s286_s27 + $0x4] ss:$8 sps:$4 sm:$0xff]   ;;  %339 = vmatprep.subr.bf16.mxu0 %v983_v1  ;;  %v988_v4 = vld [vmem:[%s286_s27] ss:$8 sps:$4 sm:$0xff]   ;;  %v991_v6 = vld [vmem:[%s286_s27 + $0x14] ss:$8 sps:$4 sm:$0xff]  }
  0x13   : > { %403 = vmatprep.subr.bf16.mxu1 %v985_v2  ;;  %340 = vmatpush1.bf16.msra.mxu0 %v987_v3  ;;  %v993_v7 = vld [vmem:[%s286_s27 + $0x30] ss:$8 sps:$4 sm:$0xff]   ;;  %s1142_s23 = smov 0  }
  0x14   : > { %404 = vmatpush1.bf16.msra.mxu1 %v988_v4  ;;  %341 = vmatprep.subr.bf16.mxu0 %v989_v5  ;;  %v994_v8 = vld [vmem:[%s286_s27 + $0x10] ss:$8 sps:$4 sm:$0xff]   ;;  %s295_s27 = scalar_lea.vmem %s1196_s4, %s1116_s15 }
  0x15   : > { %405 = vmatprep.subr.bf16.mxu1 %v991_v6  ;;  %v444_v16 = vld [vmem:[%s295_s27] sm:$0x3] }
  0x16   : > { %v449_v18 = vrot.slane %v444_v16, %v1130_v15  ;;  %v453_v21 = vrot.slane %v444_v16, %v1132_v17  ;;  %v601_v32 = vld [vmem:[%s295_s27] sm:$0x3] }
  0x17   : > { %342 = vmatpush1.bf16.msra.mxu0 %v993_v7  ;;  %v606_v33 = vrot.slane %v601_v32, %v1130_v15  ;;  %v610_v36 = vrot.slane %v601_v32, %v1132_v17 }
  0x18   : > { %406 = vmatpush1.bf16.msra.mxu1 %v994_v8  ;;  %496 = vmatprep.subr.bf16.mxu0 %v983_v1 }
  0x19   : > { %560 = vmatprep.subr.bf16.mxu1 %v985_v2 }
  0x1a   : > { %918 = vmatmul.mubr.msk.bf16.vlgmr.msra.gmra.mrb[0].mxu0 %vm335_vm0, %v310_v9 }
  0x1b   : > { %923 = vmatmul.mubr.msk.bf16.vlgmr.msra.gmra.mrb[0].mxu1 %vm335_vm0, %v305_v10  ;;  %497 = vmatpush1.bf16.msra.mxu0 %v987_v3 }
  0x1c   : > { %561 = vmatpush1.bf16.msra.mxu1 %v988_v4  ;;  %498 = vmatprep.subr.bf16.mxu0 %v989_v5 }
  0x1d   : > { %562 = vmatprep.subr.bf16.mxu1 %v991_v6  ;;  %528 = vmatprep.mubr.bf16.mxu0 %v1037_v0 }
  0x1e   : > { %592 = vmatprep.mubr.bf16.mxu1 %v1037_v0 }
  0x1f   : > { %499 = vmatpush1.bf16.msra.mxu0 %v993_v7 }
  0x20   : > { %563 = vmatpush1.bf16.msra.mxu1 %v994_v8 }
  0x22   : > { %930 = vmatmul.mubr.msk.bf16.vlgmr.msra.gmra.mrb[4].mxu0 %vm335_vm0, %v925_v11 }
  0x23   : > { %935 = vmatmul.mubr.msk.bf16.vlgmr.msra.gmra.mrb[4].mxu1 %vm335_vm0, %v924_v12 }
  0xed   : > { %v373_v19 = vpop.f32.mrb[0].mxu0 }
  0xee   : > { %v437_v20 = vpop.f32.mrb[0].mxu1  ;;  %v375_v23 = vpop.f32.mrb[1].mxu0 }
  0xef   : > { %v438_v22 = vadd.f32 %v437_v20, %v373_v19  ;;  %v439_v24 = vpop.f32.mrb[1].mxu1  ;;  %v377_v26 = vpop.f32.mrb[2].mxu0 }
  0xf0   : > { %v440_v25 = vadd.f32 %v439_v24, %v375_v23  ;;  %v441_v27 = vpop.f32.mrb[2].mxu1  ;;  %v378_v29 = vpop.f32.mrb[3].mxu0 }
  0xf1   : > { %v456_v28 = vadd.f32 %v449_v18, %v438_v22  ;;  %v442_v30 = vpop.f32.mrb[3].mxu1 }
  0xf2   : > { %v457_v31 = vadd.f32 %v453_v21, %v440_v25 }
  0xf3   : > { %458 = vst [vmem:[#allocation2] sm:$0x3f] %v456_v28 }
  0xf4   : > { %460 = vst.msk [vmem:[#allocation2 + $0x8] sm:$0x3f] %vm459_vm1, %v457_v31 }
  0xf5   : > { %v530_v34 = vpop.f32.mrb[4].mxu0 }
  0xf6   : > { %v594_v35 = vpop.f32.mrb[4].mxu1  ;;  %v532_v38 = vpop.f32.mrb[5].mxu0 }
  0xf7   : > { %v595_v37 = vadd.f32 %v594_v35, %v530_v34  ;;  %v596_v39 = vpop.f32.mrb[5].mxu1  ;;  %v534_v41 = vpop.f32.mrb[6].mxu0 }
  0xf8   : > { %v597_v40 = vadd.f32 %v596_v39, %v532_v38  ;;  %v598_v42 = vpop.f32.mrb[6].mxu1  ;;  %v535_v44 = vpop.f32.mrb[7].mxu0 }
  0xf9   : > { %v613_v43 = vadd.f32 %v606_v33, %v595_v37  ;;  %v599_v45 = vpop.f32.mrb[7].mxu1 }
  0xfa   : > { %v614_v46 = vadd.f32 %v610_v36, %v597_v40 }
  0xfb   : > { %616 = vst [vmem:[#allocation2 + $0x10] sm:$0x3f] %v613_v43 }
  0xfc   : > { %617 = vst.msk [vmem:[#allocation2 + $0x18] sm:$0x3f] %vm459_vm1, %v614_v46 }
  0xfd LB: >> { %v995_v48 = vld [vmem:[%s1097_s30 + $0x4] ss:$8 sps:$4 sm:$0xff]   ;;  %v997_v49 = vld [vmem:[%s1097_s30] ss:$8 sps:$4 sm:$0xff]   ;;  %v1038_v50 = vmov 0   ;;  %v665_v51 = vpack.c.bf16 %v1031_v47, %v1031_v47  ;;  %s1039_s28 = smov 64   ;;  %s1035_s23 = sphi %s1142_s23, %s623_s23   ;;  %v1031_v47 = vphi %v1140_v47, %v1199_v47  }
  0xfe   : >> { %765 = vmatprep.mubr.bf16.mxu0 %v1038_v50  ;;  %733 = vmatprep.subr.bf16.mxu0 %v995_v48  ;;  %v998_v52 = vld [vmem:[%s1097_s30 + $0x14] ss:$8 sps:$4 sm:$0xff]   ;;  %v1000_v53 = vld [vmem:[%s1097_s30 + $0x10] ss:$8 sps:$4 sm:$0xff]   ;;  %v1001_v54 = vld [vmem:[%s1097_s30 + $0x24] ss:$8 sps:$4 sm:$0xff]  }
  0xff   : >> { %734 = vmatpush1.bf16.msra.mxu0 %v997_v49  ;;  %687 = vrot.lane.b32.xlu0 %v665_v51, %s1039_s28  ;;  %v1003_v55 = vld [vmem:[%s1097_s30 + $0x20] ss:$8 sps:$4 sm:$0xff]   ;;  %v1004_v56 = vld [vmem:[%s1097_s30 + $0x34] ss:$8 sps:$4 sm:$0xff]   ;;  %v1006_v57 = vld [vmem:[%s1097_s30 + $0x30] ss:$8 sps:$4 sm:$0xff]  }
 0x100   : >> { %735 = vmatprep.subr.bf16.mxu0 %v998_v52  ;;  %vm729_vm2 = vcmask 523264   ;;  %p625_p4 = scmp.eq.s32.totalorder %s1082_s22, 0  ;;  %s626_s29 = ssub.s32 5, %s1035_s23  ;;  %v674_v61 = vld [vmem:[%s299_s18] sm:$0x3]  ;;  %vm662_vm3 = vcmask 1040384  }
 0x101   : >> { %v679_v0 = vrot.slane %v674_v61, %v1130_v15  ;;  %v683_v11 = vrot.slane %v674_v61, %v1132_v17 }
 0x102   : >> { %s627_s7 = scalar_select %p625_p4, %s1035_s23, %s626_s29 }
 0x103   : >> { %736 = vmatpush1.bf16.msra.mxu0 %v1000_v53  ;;  %s623_s23 = sadd.s32 1, %s1035_s23  }
 0x104   : >> { %737 = vmatprep.subr.bf16.mxu0 %v1001_v54  ;;  %s628_s8 = sshra.s32 %s627_s7, 3  ;;  %s631_s9 = sand.u32 7, %s627_s7 }
 0x105   : >> { %s954_s10 = sshll.u32 %s628_s8, 4  ;;  %p620_p5 = scmp.ge.s32.totalorder %s623_s23, 6  }
 0x106   : >> { %s634_s11 = sadd.s32 %s954_s10, %s631_s9  ;;  %s1040_s16 = smov (%p620_p5), 64   ;;  %vm796_vm4 = vcmask (%p620_p5), 517120  }
 0x107   : >> { %738 = vmatpush1.bf16.msra.mxu0 %v1003_v55  ;;  %s635_s12 = scalar_lea.vmem [#allocation2], %s634_s11 }
 0x108   : >> { %739 = vmatprep.subr.bf16.mxu0 %v1004_v56  ;;  %v636_v59 = vld [vmem:[%s635_s12] ss:$8 sm:$0x3]  ;;  %v939_v60 = vld [vmem:[%s635_s12 + $0x10] ss:$8 sm:$0x3] }
 0x109   : >> { %v644_v62 = vrot.slane %v636_v59, %v1130_v15  ;;  %v655_v63 = vrot.slane %v939_v60, %v1130_v15  ;;  %v648_v12 = vrot.slane %v636_v59, %v1132_v17  ;;  %v659_v13 = vrot.slane %v939_v60, %v1132_v17 }
 0x10b   : >> { %740 = vmatpush1.bf16.msra.mxu0 %v1006_v57  ;;  %v663_v1 = vsel %vm662_vm3, %v644_v62, %v655_v63  ;;  %v664_v18 = vsel %vm662_vm3, %v648_v12, %v659_v13 }
 0x171   : >> { %v688_v58 = vpop.permute.xlu0 %687 }
 0x172   : >> { %948 = vmatmul.mubr.msk.bf16.vlgmr.msra.gmra.mrb[0].mxu0 %vm729_vm2, %v688_v58 }
 0x245   : >> { %v767_v2 = vpop.f32.mrb[0].mxu0 }
 0x246   : >> { %v768_v3 = vadd.f32 %v767_v2, %v679_v0  ;;  %v769_v4 = vpop.f32.mrb[1].mxu0 }
 0x247   : >> { %v771_v5 = vpop.f32.mrb[2].mxu0  ;;  %v770_v14 = vadd.f32 %v769_v4, %v683_v11 }
 0x248   : >> { %v774_v6 = vadd.f32 %v768_v3, %v663_v1  ;;  %v772_v7 = vpop.f32.mrb[3].mxu0 }
 0x24a   : >> { %v949_v8 = vmul.f32 -1.442695, %v774_v6 }
 0x24c   : >> { %1007 = vpow2.f32 %v949_v8 }
 0x256   : >> { %v1008_v9 = vpop.eup %1007 }
 0x257   : >> { %v778_v10 = vadd.f32 1.0, %v1008_v9 }
 0x259   : >> { %1009 = vrcp.f32 %v778_v10 }
 0x263   : >> { %v1010_v16 = vpop.eup %1009 }
 0x264   : >> { %v781_v19 = vmul.f32 %v1010_v16, %v770_v14  ;;  %v784_v22 = vsub.f32 1.0, %v1010_v16  ;;  %v790_v24 = vmul.f32 %v1031_v47, %v1010_v16 }
 0x266   : >> { %v782_v20 = vadd.f32 %v781_v19, %v664_v18 }
 0x268   : >> { %1011 = vtanh.f32 %v782_v20 }
 0x272   : >> { %v1012_v21 = vpop.eup %1011 }
 0x273   : >> { %786 = vrot.lane.b32.xlu0 %v1012_v21, %s1039_s28 }
 0x2e4   : > { %622 = sbr.rel (!%p620_p5) target bundleno = 253 (0xfd), region = 95 }
 0x2e5   : >> { %v787_v23 = vpop.permute.xlu0 %786 }
 0x2e6   : >> { %v789_v25 = vmul.f32 %v787_v23, %v784_v22 }
 0x2e8   : >> { %v791_v26 = vadd.f32 %v790_v24, %v789_v25  }
 0x2ea   : >> { %v1199_v47 = vmov %v791_v26  ;;  %793 = vrot.lane.b32.xlu0 (%p620_p5), %v791_v26, %s1040_s16 }
 0x35c   : > { %v794_v27 = vpop.permute.xlu0 %793 }
 0x35d   : > { %797 = vst.msk [vmem:[%s303_s24] sm:$0x3] %vm796_vm4, %v794_v27 }
 0x35e PF: > { %s16_s21 = sadd.s32 1, %s1027_s21  }
 0x35f   : > { %p13_p6 = scmp.ge.s32.totalorder %s16_s21, 4  }
 0x361   :  { %15 = sbr.rel (!%p13_p6) target bundleno = 1 (0x1), region = 106 }

// kernel: mhc_model_forward.7
= control target key start
LH: loop header
LB: loop body
LE: loop exit
PB: predicated region body
PF: predicated region fallthrough
CT: control target
= control target key end

     0   :  { %v360_v0 = vmov 0.0   ;;  %vm361_vm0 = vmmov 0   ;;  %vm68_vm1 = vcmask 523264   ;;  %vm271_vm2 = vcmask 1024   ;;  %s449_s1 = inlined_call_operand.vmem [shape: bf16[128,64], index: 1, kind: input, shape index: {}]   ;;  %s450_s0 = inlined_call_operand.vmem [shape: f32[2,2,64], index: 0, kind: input, shape index: {}]   ;;  %s451_s3 = inlined_call_operand.vmem [shape: bf16[64,1], index: 3, kind: input, shape index: {}]   ;;  %s452_s4 = inlined_call_operand.<no memory space> [shape: f32[1,1], index: 4, kind: input, shape index: {}]   ;;  %s453_s2 = inlined_call_operand.vmem [shape: f32[1,64], index: 2, kind: input, shape index: {}]   ;;  %s454_s5 = inlined_call_operand.vmem [shape: f32[2,1], index: 5, kind: output, shape index: {}]  }
   0x1   :  { %310 = vmatprep.subr.bf16.mxu0 %v360_v0  ;;  %322 = vmatprep.subr.bf16.mxu1 %v360_v0  ;;  %v348_v1 = vld [vmem:[%s449_s1 + $0x20] sm:$0xff]   ;;  %v350_v3 = vld [vmem:[%s449_s1 + $0x28] sm:$0xff]   ;;  %v352_v5 = vld [vmem:[%s449_s1 + $0x30] sm:$0xff]   ;;  %v10_v17 = vstv %s452_s4 }
   0x2   :  { %v349_v2 = vld [vmem:[%s449_s1] sm:$0xff]   ;;  %318 = vmatprep.mubr.msk.bf16.mxu0 %vm361_vm0, %v360_v0  ;;  %330 = vmatprep.mubr.msk.bf16.mxu1 %vm361_vm0, %v360_v0  ;;  %v351_v4 = vld [vmem:[%s449_s1 + $0x8] sm:$0xff]   ;;  %v353_v6 = vld [vmem:[%s449_s1 + $0x10] sm:$0xff]   ;;  %11 = vst [vmem:[#allocation2] sm:$0x1] %v10_v17 }
   0x3   :  { %311 = vmatpush3.bf16.msra.mxu0 %v348_v1  ;;  %323 = vmatpush3.bf16.msra.mxu1 %v349_v2  ;;  %v354_v7 = vld [vmem:[%s449_s1 + $0x38] sm:$0xff]   ;;  %v277_v9 = vld [vmem:[%s450_s0 + $0x2] sm:$0x3]  ;;  %v23_v10 = vld [vmem:[%s450_s0] sm:$0x3] }
   0x4   :  { %312 = vmatprep.subr.bf16.mxu0 %v360_v0  ;;  %324 = vmatprep.subr.bf16.mxu1 %v360_v0  ;;  %v355_v8 = vld [vmem:[%s449_s1 + $0x18] sm:$0xff]   ;;  %v27_v11 = vpack.c.bf16 %v277_v9, %v277_v9  ;;  %v24_v12 = vpack.c.bf16 %v23_v10, %v23_v10  ;;  %v356_v13 = vld [vmem:[%s451_s3] sm:$0xff]   ;;  %v357_v14 = vld [vmem:[%s451_s3 + $0x8] sm:$0xff]  }
   0x5   :  { %v358_v15 = vld [vmem:[%s451_s3 + $0x10] sm:$0xff]   ;;  %v359_v16 = vld [vmem:[%s451_s3 + $0x18] sm:$0xff]   ;;  %v288_v20 = vld [vmem:[%s453_s2] ss:$0 sm:$0xff] }
   0x7   :  { %313 = vmatpush3.bf16.msra.mxu0 %v350_v3  ;;  %325 = vmatpush3.bf16.msra.mxu1 %v351_v4 }
   0x8   :  { %314 = vmatprep.subr.bf16.mxu0 %v360_v0  ;;  %326 = vmatprep.subr.bf16.mxu1 %v360_v0 }
   0x9   :  { %v289_v31 = vld [vmem:[#allocation2] ss:$0 sm:$0xff] }
   0xb   :  { %315 = vmatpush3.bf16.msra.mxu0 %v352_v5  ;;  %327 = vmatpush3.bf16.msra.mxu1 %v353_v6 }
   0xc   :  { %316 = vmatprep.subr.bf16.mxu0 %v360_v0  ;;  %328 = vmatprep.subr.bf16.mxu1 %v360_v0 }
   0xf   :  { %317 = vmatpush3.bf16.msra.mxu0 %v354_v7  ;;  %329 = vmatpush3.bf16.msra.mxu1 %v355_v8 }
  0x10   :  { %334 = vmatprep.subr.bf16.mxu0 %v360_v0 }
  0x12   :  { %319 = vmatmul.mubr.msk.bf16.vlgmr.msra.gmra.mrb[0].mxu0 %vm68_vm1, %v27_v11  ;;  %331 = vmatmul.mubr.msk.bf16.vlgmr.msra.gmra.mrb[0].mxu1 %vm68_vm1, %v24_v12 }
  0x13   :  { %335 = vmatpush3.bf16.msra.mxu0 %v356_v13  ;;  %342 = vmatprep.mubr.msk.bf16.mxu0 %vm361_vm0, %v360_v0 }
  0x14   :  { %336 = vmatprep.subr.bf16.mxu0 %v360_v0 }
  0x17   :  { %337 = vmatpush3.bf16.msra.mxu0 %v357_v14 }
  0x18   :  { %338 = vmatprep.subr.bf16.mxu0 %v360_v0 }
  0x1b   :  { %339 = vmatpush3.bf16.msra.mxu0 %v358_v15 }
  0x1c   :  { %340 = vmatprep.subr.bf16.mxu0 %v360_v0 }
  0x1f   :  { %341 = vmatpush3.bf16.msra.mxu0 %v359_v16 }
  0xe5   :  { %v106_v18 = vpop.f32.mrb[0].mxu0  ;;  %v173_v19 = vpop.f32.mrb[0].mxu1 }
  0xe6   :  { %v320_v21 = vpop.f32.mrb[1].mxu0  ;;  %v174_v22 = vadd.f32 %v173_v19, %v106_v18  ;;  %v332_v23 = vpop.f32.mrb[1].mxu1 }
  0xe7   :  { %v109_v24 = vpop.f32.mrb[2].mxu0  ;;  %v176_v25 = vpop.f32.mrb[2].mxu1 }
  0xe8   :  { %v321_v26 = vpop.f32.mrb[3].mxu0  ;;  %v186_v27 = vadd.f32 %v288_v20, %v174_v22  ;;  %v333_v28 = vpop.f32.mrb[3].mxu1 }
  0xea   :  { %v187_v29 = vmax.f32 %v186_v27, 0.0 }
  0xec   :  { %v188_v30 = vpack.c.bf16 %v187_v29, %v187_v29 }
  0xee   :  { %343 = vmatmul.mubr.msk.bf16.vlgmr.msra.gmra.mrb[4].mxu0 %vm68_vm1, %v188_v30 }
 0x1c1   :  { %v265_v32 = vpop.f32.mrb[4].mxu0 }
 0x1c2   :  { %v266_v33 = vadd.f32 %v289_v31, %v265_v32  ;;  %v344_v34 = vpop.f32.mrb[5].mxu0 }
 0x1c3   :  { %v268_v35 = vpop.f32.mrb[6].mxu0 }
 0x1c4   :  { %272 = vst.msk [vmem:[%s454_s5] sm:$0x3] %vm271_vm2, %v266_v33  ;;  %v345_v36 = vpop.f32.mrb[7].mxu0 }

</bundles_post_ra>
